<compile_context>
chip_gen: v7x
topology: tpu7x:2x2x1
jax: 0.10.0
libtpu: 0.0.40
codegen_flags: <defaults>
</compile_context>

<pallas_src>
import functools

import jax
import jax.numpy as jnp
from jax import lax
from jax.experimental import pallas as pl
from jax.experimental.pallas import tpu as pltpu


# ----------------------------- bilinear helpers ------------------------------
def _src_index(out_size, in_size):
    """PyTorch bilinear (align_corners=False) source indices and fractions."""
    scale = in_size / out_size
    s = jnp.maximum(scale * (jnp.arange(out_size, dtype=jnp.float32) + 0.5) - 0.5, 0.0)
    i0 = jnp.clip(jnp.floor(s).astype(jnp.int32), 0, in_size - 1)
    i1 = jnp.minimum(i0 + 1, in_size - 1)
    frac = s - i0.astype(jnp.float32)
    return i0, i1, frac


def _interp_matrix(out_size, in_size):
    """A (out_size, in_size) so that A @ v is the 1-D bilinear resize of v."""
    i0, i1, frac = _src_index(out_size, in_size)
    rows = jnp.arange(out_size)
    a = jnp.zeros((out_size, in_size), jnp.float32)
    a = a.at[rows, i0].add(1.0 - frac)
    a = a.at[rows, i1].add(frac)
    return a


# --------------------------------- kernel ------------------------------------
def _spatial_map_kernel(H, W, x_ref, w1_ref, b1_ref, w2_ref, b2_ref, ut_ref, o_ref):
    # x_ref : (TB, Cin, H*W) bf16   flattened NCHW input (channels on sublanes)
    # w1_ref: (C1, 9*Cin)    bf16   tap-fused conv1 weights (BN + bias folded)
    # b1_ref: (C1, 1)        f32
    # w2_ref: (C2, 9*C1)     bf16
    # b2_ref: (C2, 1)        f32
    # ut_ref: (H*W, S*S)     bf16   kron(Ah, Aw)^T bilinear-resize matrix
    # o_ref : (TB, C2, S*S)  f32    lane-dense output
    tb, _, hw = x_ref.shape
    c2 = w2_ref.shape[0]
    ss = ut_ref.shape[1]
    P = W + 1  # flat zero-pad length; absorbs the H-border (dh = +-1) taps.

    # Per-pixel column index for the two W-border masks (shared by both convs).
    w_pos = lax.broadcasted_iota(jnp.int32, (1, hw), 1) % W
    mask_l = w_pos >= 1          # tap column kw == 0 (dw = -1) is valid here
    mask_r = w_pos <= W - 2      # tap column kw == 2 (dw = +1) is valid here

    def conv3x3_bn_relu(x2d, w_ref, b_ref):
        # x2d: (C, H*W) bf16.  3x3 same-padding conv + folded BN bias + ReLU as a
        # single (Cout, 9*C) @ (9*C, H*W) MXU matmul with fp32 accumulation.
        c = x2d.shape[0]
        zpad = jnp.zeros((c, P), x2d.dtype)
        xpad = jnp.concatenate([zpad, x2d, zpad], axis=1)        # (C, H*W + 2P)
        taps = []
        for kh in range(3):
            for kw in range(3):
                off = (kh - 1) * W + (kw - 1)
                t = xpad[:, P + off:P + off + hw]                # (C, H*W)
                if kw == 0:
                    t = jnp.where(mask_l, t, jnp.zeros_like(t))
                elif kw == 2:
                    t = jnp.where(mask_r, t, jnp.zeros_like(t))
                taps.append(t)
        im2col = jnp.concatenate(taps, axis=0)                   # (9*C, H*W)
        acc = jnp.dot(w_ref[...], im2col,
                      preferred_element_type=jnp.float32)        # (Cout, H*W) f32
        return jnp.maximum(acc + b_ref[...], 0.0)

    # Conv stack per batch element of the tile (TB is small and static).
    h2s = []
    for b in range(tb):
        h1 = conv3x3_bn_relu(x_ref[b], w1_ref, b1_ref).astype(jnp.bfloat16)
        h2s.append(conv3x3_bn_relu(h1, w2_ref, b2_ref))          # (C2, H*W) f32
    h2 = h2s[0] if tb == 1 else jnp.concatenate(h2s, axis=0)     # (TB*C2, H*W)

    # Bilinear upsample: one batched (TB*C2, H*W) @ (H*W, S*S) bf16 MXU matmul,
    # stored lane-dense (S*S lanes).
    y = jnp.dot(h2.astype(jnp.bfloat16), ut_ref[...],
                preferred_element_type=jnp.float32)              # (TB*C2, S*S)
    o_ref[...] = y.reshape(tb, c2, ss)


# -------------------------------- wrapper -------------------------------------
def _pad_to_multiple(a, axis, multiple):
    pad = (-a.shape[axis]) % multiple
    if pad == 0:
        return a
    widths = [(0, 0)] * a.ndim
    widths[axis] = (0, pad)
    return jnp.pad(a, widths)


def spatial_map_forward(x, conv1, bn1, conv2, bn2, spa_size, *, eps=1e-5,
                        batch_block=None):
    """SpatialMap.forward (eval-mode BN). x: (B, C_in, H, W) -> (B, C_out, spa, spa)."""
    w1, b1 = conv1
    g1, be1, mu1, va1 = bn1
    w2, b2 = conv2
    g2, be2, mu2, va2 = bn2

    B, cin, H, W = x.shape
    c1 = w1.shape[0]
    c2 = w2.shape[0]
    S = spa_size
    HW = H * W

    # Fold eval-mode BatchNorm (+ conv bias) into the conv weights / bias.
    def fold(w, b, g, beta, mu, var):
        s = g / jnp.sqrt(var + eps)
        return w * s[:, None, None, None], (b - mu) * s + beta

    w1f, b1f = fold(w1, b1, g1, be1, mu1, va1)
    w2f, b2f = fold(w2, b2, g2, be2, mu2, va2)

    # Pad channel counts to multiples of 8 so the in-kernel tap concatenation is
    # sublane-aligned (padded channels have zero weights / bias -> no effect).
    cin_p = cin + (-cin) % 8
    c1_p = c1 + (-c1) % 8
    w1f = _pad_to_multiple(_pad_to_multiple(w1f, 1, 8), 0, 8)    # (C1p, Cinp, 3, 3)
    b1f = _pad_to_multiple(b1f, 0, 8)                            # (C1p,)
    w2f = _pad_to_multiple(w2f, 1, 8)                            # (C2, C1p, 3, 3)

    # Tap-fused (Cout, kh, kw, Cin) -> (Cout, 9*Cin) bf16 weights; column order
    # kh*3*Cin + kw*Cin + c matches the kernel's im2col row order.
    w1t = jnp.transpose(w1f, (0, 2, 3, 1)).reshape(c1_p, 9 * cin_p).astype(jnp.bfloat16)
    w2t = jnp.transpose(w2f, (0, 2, 3, 1)).reshape(c2, 9 * c1_p).astype(jnp.bfloat16)
    b1r = b1f.reshape(c1_p, 1).astype(jnp.float32)
    b2r = b2f.reshape(c2, 1).astype(jnp.float32)

    # Flattened bf16 NC(HW) input; padding / window gathering happens in-kernel.
    xr = _pad_to_multiple(x, 1, 8).reshape(B, cin_p, HW).astype(jnp.bfloat16)

    # Separable 1-D bilinear factors folded into one (H*W, S*S) matrix, bf16
    # (exact for the x2 resize weights 0 / .25 / .75 / 1), pre-transposed so the
    # kernel's matmul output is (C_out, S*S) and stores are lane-dense.
    ah = _interp_matrix(S, H)
    aw = _interp_matrix(S, W)
    ut = jnp.kron(ah, aw).T.astype(jnp.bfloat16)                 # (H*W, S*S)

    # Batch tile: prefer >= 4 grid steps (software pipelining + v7x megacore),
    # else >= 2, else a single step.
    if batch_block is None:
        TB = B
        for min_steps in (4, 2, 1):
            cands = [d for d in range(1, B + 1) if B % d == 0 and B // d >= min_steps]
            if cands:
                TB = max(cands)
                break
    else:
        TB = batch_block
    assert B % TB == 0, (B, TB)
    grid = (B // TB,)

    # Explicit VMEM budget (double-buffered x/out tiles + resident weights / ut).
    est = (2 * TB * cin_p * HW * 2          # x tile   (bf16, double-buffered)
           + 2 * TB * c2 * S * S * 4        # out tile (f32, double-buffered)
           + HW * S * S * 2                 # resize matrix (bf16)
           + (9 * cin_p * c1_p + 9 * c1_p * c2) * 2 + (c1_p + c2) * 4)
    vmem_limit = int(min(max(4 * est, 32 << 20), 64 << 20))

    out = pl.pallas_call(
        functools.partial(_spatial_map_kernel, H, W),
        out_shape=jax.ShapeDtypeStruct((B, c2, S * S), jnp.float32),
        grid_spec=pltpu.PrefetchScalarGridSpec(
            num_scalar_prefetch=0,
            grid=grid,
            in_specs=[
                pl.BlockSpec((TB, cin_p, HW), lambda i: (i, 0, 0)),
                pl.BlockSpec((c1_p, 9 * cin_p), lambda i: (0, 0)),
                pl.BlockSpec((c1_p, 1), lambda i: (0, 0)),
                pl.BlockSpec((c2, 9 * c1_p), lambda i: (0, 0)),
                pl.BlockSpec((c2, 1), lambda i: (0, 0)),
                pl.BlockSpec((HW, S * S), lambda i: (0, 0)),
            ],
            out_specs=pl.BlockSpec((TB, c2, S * S), lambda i: (i, 0, 0)),
        ),
        compiler_params=pltpu.CompilerParams(
            dimension_semantics=("parallel",),
            vmem_limit_bytes=vmem_limit),
    )(xr, w1t, b1r, w2t, b2r, ut)

    return out.reshape(B, c2, S, S)


# ------------------------------- reference ------------------------------------
def _bilinear_resize_nchw(x, out_h, out_w):
    h0, h1, fh = _src_index(out_h, x.shape[2])
    w0, w1, fw = _src_index(out_w, x.shape[3])
    fh = fh[None, None, :, None]
    fw = fw[None, None, None, :]
    xh0, xh1 = x[:, :, h0, :], x[:, :, h1, :]
    top = xh0[:, :, :, w0] * (1.0 - fw) + xh0[:, :, :, w1] * fw
    bot = xh1[:, :, :, w0] * (1.0 - fw) + xh1[:, :, :, w1] * fw
    return top * (1.0 - fh) + bot * fh


def reference(x, conv1, bn1, conv2, bn2, spa_size, eps=1e-5):
    def conv_bn_relu(h, conv, bn):
        w, b = conv
        g, beta, mu, var = bn
        y = lax.conv_general_dilated(h, w, window_strides=(1, 1),
                                     padding=((1, 1), (1, 1)),
                                     dimension_numbers=("NCHW", "OIHW", "NCHW"))
        y = y + b[None, :, None, None]
        y = (y - mu[None, :, None, None]) / jnp.sqrt(var[None, :, None, None] + eps)
        y = y * g[None, :, None, None] + beta[None, :, None, None]
        return jnp.maximum(y, 0.0)

    y = conv_bn_relu(x, conv1, bn1)
    y = conv_bn_relu(y, conv2, bn2)
    return _bilinear_resize_nchw(y, spa_size, spa_size)


# --------------------------------- demo ---------------------------------------
if __name__ == "__main__":
    # SpatialMap(in_ch=4, out_ch=8, spa_size=32) on a (2, 4, 16, 16) input.
    B, in_ch, out_ch, img = 2, 4, 8, 16
    spa_size = 32
    init_ch = in_ch // 2 if in_ch > out_ch else in_ch * 2     # -> 8

    key = jax.random.PRNGKey(0)
    ks = jax.random.split(key, 13)
    x = jax.random.normal(ks[0], (B, in_ch, img, img), jnp.float32)

    w1 = 0.05 * jax.random.normal(ks[1], (init_ch, in_ch, 3, 3), jnp.float32)
    b1 = 0.05 * jax.random.normal(ks[2], (init_ch,), jnp.float32)
    bn1 = (1.0 + 0.1 * jax.random.normal(ks[3], (init_ch,), jnp.float32),          # gamma
           0.05 * jax.random.normal(ks[4], (init_ch,), jnp.float32),               # beta
           0.05 * jax.random.normal(ks[5], (init_ch,), jnp.float32),               # running mean
           1.0 + 0.1 * jnp.abs(jax.random.normal(ks[6], (init_ch,), jnp.float32)))  # running var

    w2 = 0.05 * jax.random.normal(ks[7], (out_ch, init_ch, 3, 3), jnp.float32)
    b2 = 0.05 * jax.random.normal(ks[8], (out_ch,), jnp.float32)
    bn2 = (1.0 + 0.1 * jax.random.normal(ks[9], (out_ch,), jnp.float32),
           0.05 * jax.random.normal(ks[10], (out_ch,), jnp.float32),
           0.05 * jax.random.normal(ks[11], (out_ch,), jnp.float32),
           1.0 + 0.1 * jnp.abs(jax.random.normal(ks[12], (out_ch,), jnp.float32)))

    out = spatial_map_forward(x, (w1, b1), bn1, (w2, b2), bn2, spa_size)
    out = jax.block_until_ready(out)

    ref = reference(x, (w1, b1), bn1, (w2, b2), bn2, spa_size)
    assert out.shape == (B, out_ch, spa_size, spa_size), out.shape
    max_err = float(jnp.max(jnp.abs(out - ref)))
    # bf16 MXU operands / bf16 hidden activations vs the fp32 reference.
    assert jnp.allclose(out, ref, atol=3e-2, rtol=3e-2), max_err

    print("KERNEL_OK")
</pallas_src>

<mosaic_0001>
module attributes {stable_mosaic.version = 11 : i64} {
  func.func @_spatial_map_kernel(%arg0: i32, %arg1: memref<1x8x256xbf16, #tpu.memory_space<vmem>>, %arg2: memref<8x72xbf16, #tpu.memory_space<vmem>>, %arg3: memref<8x1xf32, #tpu.memory_space<vmem>>, %arg4: memref<8x72xbf16, #tpu.memory_space<vmem>>, %arg5: memref<8x1xf32, #tpu.memory_space<vmem>>, %arg6: memref<256x1024xbf16, #tpu.memory_space<vmem>>, %arg7: memref<1x8x1024xf32, #tpu.memory_space<vmem>>) attributes {dimension_semantics = [#tpu.dimension_semantics<parallel>], iteration_bounds = array<i64: 2>, scalar_prefetch = 0 : i64, scratch_operands = 0 : i64, tpu.core_type = #tpu.core_type<tc>, window_params = [{transform_indices = @transform_0, window_bounds = array<i64: 1, 8, 256>}, {pipeline_mode = #tpu.pipeline_mode<synchronous>, transform_indices = @transform_1, window_bounds = array<i64: 8, 72>}, {pipeline_mode = #tpu.pipeline_mode<synchronous>, transform_indices = @transform_2, window_bounds = array<i64: 8, 1>}, {pipeline_mode = #tpu.pipeline_mode<synchronous>, transform_indices = @transform_3, window_bounds = array<i64: 8, 72>}, {pipeline_mode = #tpu.pipeline_mode<synchronous>, transform_indices = @transform_4, window_bounds = array<i64: 8, 1>}, {pipeline_mode = #tpu.pipeline_mode<synchronous>, transform_indices = @transform_5, window_bounds = array<i64: 256, 1024>}, {transform_indices = @transform_6, window_bounds = array<i64: 1, 8, 1024>}]} {
    %0 = tpu.iota {dimensions = array<i32: 1>} : vector<1x256xi32>
    %c16_i32 = arith.constant 16 : i32
    %c0_i32 = arith.constant 0 : i32
    %1 = arith.cmpi eq, %c16_i32, %c0_i32 : i32
    %c1_i32 = arith.constant 1 : i32
    %2 = arith.select %1, %c1_i32, %c16_i32 : i32
    %3 = vector.broadcast %2 : i32 to vector<1x256xi32>
    %4 = arith.remsi %0, %3 : vector<1x256xi32>
    %c0_i32_0 = arith.constant 0 : i32
    %5 = vector.broadcast %c0_i32_0 : i32 to vector<1x256xi32>
    %6 = arith.cmpi ne, %4, %5 : vector<1x256xi32>
    %c0_i32_1 = arith.constant 0 : i32
    %7 = vector.broadcast %c0_i32_1 : i32 to vector<1x256xi32>
    %8 = arith.cmpi slt, %4, %7 : vector<1x256xi32>
    %c0_i32_2 = arith.constant 0 : i32
    %9 = arith.cmpi slt, %2, %c0_i32_2 : i32
    %10 = vector.broadcast %9 : i1 to vector<1x256xi1>
    %11 = vector.broadcast %10 : vector<1x256xi1> to vector<1x256xi1>
    %12 = arith.xori %8, %11 : vector<1x256xi1>
    %13 = arith.andi %12, %6 : vector<1x256xi1>
    %14 = vector.broadcast %2 : i32 to vector<1x256xi32>
    %15 = arith.addi %4, %14 : vector<1x256xi32>
    %16 = arith.select %13, %15, %4 : vector<1x256xi1>, vector<1x256xi32>
    %c1_i32_3 = arith.constant 1 : i32
    %17 = vector.broadcast %c1_i32_3 : i32 to vector<1x256xi32>
    %18 = arith.cmpi sge, %16, %17 : vector<1x256xi32>
    %c14_i32 = arith.constant 14 : i32
    %19 = vector.broadcast %c14_i32 : i32 to vector<1x256xi32>
    %20 = arith.cmpi sle, %16, %19 : vector<1x256xi32>
    %c0 = arith.constant 0 : index
    %c0_4 = arith.constant 0 : index
    %c0_5 = arith.constant 0 : index
    %21 = vector.load %arg1[%c0, %c0_4, %c0_5] : memref<1x8x256xbf16, #tpu.memory_space<vmem>>, vector<1x8x256xbf16>
    %22 = vector.shape_cast %21 : vector<1x8x256xbf16> to vector<8x256xbf16>
    %cst = arith.constant 0.000000e+00 : bf16
    %23 = vector.broadcast %cst : bf16 to vector<8x17xbf16>
    %24 = tpu.concatenate %23, %22, %23 in 1 : vector<8x17xbf16>, vector<8x256xbf16>, vector<8x17xbf16> -> vector<8x290xbf16>
    %25 = vector.extract_strided_slice %24 {offsets = [0, 0], sizes = [8, 256], strides = [1, 1]} : vector<8x290xbf16> to vector<8x256xbf16>
    %cst_6 = arith.constant 0.000000e+00 : bf16
    %26 = vector.broadcast %cst_6 : bf16 to vector<8x256xbf16>
    %27 = vector.shape_cast %18 : vector<1x256xi1> to vector<1x256xi1>
    %28 = vector.broadcast %27 : vector<1x256xi1> to vector<8x256xi1>
    %29 = arith.select %28, %25, %26 : vector<8x256xi1>, vector<8x256xbf16>
    %30 = vector.extract_strided_slice %24 {offsets = [0, 1], sizes = [8, 256], strides = [1, 1]} : vector<8x290xbf16> to vector<8x256xbf16>
    %31 = vector.extract_strided_slice %24 {offsets = [0, 2], sizes = [8, 256], strides = [1, 1]} : vector<8x290xbf16> to vector<8x256xbf16>
    %cst_7 = arith.constant 0.000000e+00 : bf16
    %32 = vector.broadcast %cst_7 : bf16 to vector<8x256xbf16>
    %33 = vector.shape_cast %20 : vector<1x256xi1> to vector<1x256xi1>
    %34 = vector.broadcast %33 : vector<1x256xi1> to vector<8x256xi1>
    %35 = arith.select %34, %31, %32 : vector<8x256xi1>, vector<8x256xbf16>
    %36 = vector.extract_strided_slice %24 {offsets = [0, 16], sizes = [8, 256], strides = [1, 1]} : vector<8x290xbf16> to vector<8x256xbf16>
    %cst_8 = arith.constant 0.000000e+00 : bf16
    %37 = vector.broadcast %cst_8 : bf16 to vector<8x256xbf16>
    %38 = vector.shape_cast %18 : vector<1x256xi1> to vector<1x256xi1>
    %39 = vector.broadcast %38 : vector<1x256xi1> to vector<8x256xi1>
    %40 = arith.select %39, %36, %37 : vector<8x256xi1>, vector<8x256xbf16>
    %41 = vector.extract_strided_slice %24 {offsets = [0, 17], sizes = [8, 256], strides = [1, 1]} : vector<8x290xbf16> to vector<8x256xbf16>
    %42 = vector.extract_strided_slice %24 {offsets = [0, 18], sizes = [8, 256], strides = [1, 1]} : vector<8x290xbf16> to vector<8x256xbf16>
    %cst_9 = arith.constant 0.000000e+00 : bf16
    %43 = vector.broadcast %cst_9 : bf16 to vector<8x256xbf16>
    %44 = vector.shape_cast %20 : vector<1x256xi1> to vector<1x256xi1>
    %45 = vector.broadcast %44 : vector<1x256xi1> to vector<8x256xi1>
    %46 = arith.select %45, %42, %43 : vector<8x256xi1>, vector<8x256xbf16>
    %47 = vector.extract_strided_slice %24 {offsets = [0, 32], sizes = [8, 256], strides = [1, 1]} : vector<8x290xbf16> to vector<8x256xbf16>
    %cst_10 = arith.constant 0.000000e+00 : bf16
    %48 = vector.broadcast %cst_10 : bf16 to vector<8x256xbf16>
    %49 = vector.shape_cast %18 : vector<1x256xi1> to vector<1x256xi1>
    %50 = vector.broadcast %49 : vector<1x256xi1> to vector<8x256xi1>
    %51 = arith.select %50, %47, %48 : vector<8x256xi1>, vector<8x256xbf16>
    %52 = vector.extract_strided_slice %24 {offsets = [0, 33], sizes = [8, 256], strides = [1, 1]} : vector<8x290xbf16> to vector<8x256xbf16>
    %53 = vector.extract_strided_slice %24 {offsets = [0, 34], sizes = [8, 256], strides = [1, 1]} : vector<8x290xbf16> to vector<8x256xbf16>
    %cst_11 = arith.constant 0.000000e+00 : bf16
    %54 = vector.broadcast %cst_11 : bf16 to vector<8x256xbf16>
    %55 = vector.shape_cast %20 : vector<1x256xi1> to vector<1x256xi1>
    %56 = vector.broadcast %55 : vector<1x256xi1> to vector<8x256xi1>
    %57 = arith.select %56, %53, %54 : vector<8x256xi1>, vector<8x256xbf16>
    %58 = tpu.concatenate %29, %30, %35, %40, %41, %46, %51, %52, %57 in 0 : vector<8x256xbf16>, vector<8x256xbf16>, vector<8x256xbf16>, vector<8x256xbf16>, vector<8x256xbf16>, vector<8x256xbf16>, vector<8x256xbf16>, vector<8x256xbf16>, vector<8x256xbf16> -> vector<72x256xbf16>
    %c0_12 = arith.constant 0 : index
    %c0_13 = arith.constant 0 : index
    %59 = vector.load %arg2[%c0_12, %c0_13] : memref<8x72xbf16, #tpu.memory_space<vmem>>, vector<8x72xbf16>
    %cst_14 = arith.constant dense<0.000000e+00> : vector<8x256xf32>
    %60 = tpu.matmul %59, %58, %cst_14 {dimension_numbers = #tpu.dot_dimension_numbers<[1], [0], [0], [1], [0, 0, 1, 1], [], []>} : vector<8x72xbf16>, vector<72x256xbf16>, vector<8x256xf32> -> vector<8x256xf32>
    %c0_15 = arith.constant 0 : index
    %c0_16 = arith.constant 0 : index
    %61 = vector.load %arg3[%c0_15, %c0_16] : memref<8x1xf32, #tpu.memory_space<vmem>>, vector<8x1xf32>
    %62 = vector.broadcast %61 : vector<8x1xf32> to vector<8x256xf32>
    %63 = arith.addf %60, %62 : vector<8x256xf32>
    %cst_17 = arith.constant 0.000000e+00 : f32
    %64 = vector.broadcast %cst_17 : f32 to vector<8x256xf32>
    %65 = arith.maximumf %63, %64 : vector<8x256xf32>
    %66 = arith.truncf %65 : vector<8x256xf32> to vector<8x256xbf16>
    %cst_18 = arith.constant 0.000000e+00 : bf16
    %67 = vector.broadcast %cst_18 : bf16 to vector<8x17xbf16>
    %68 = tpu.concatenate %67, %66, %67 in 1 : vector<8x17xbf16>, vector<8x256xbf16>, vector<8x17xbf16> -> vector<8x290xbf16>
    %69 = vector.extract_strided_slice %68 {offsets = [0, 0], sizes = [8, 256], strides = [1, 1]} : vector<8x290xbf16> to vector<8x256xbf16>
    %cst_19 = arith.constant 0.000000e+00 : bf16
    %70 = vector.broadcast %cst_19 : bf16 to vector<8x256xbf16>
    %71 = vector.shape_cast %18 : vector<1x256xi1> to vector<1x256xi1>
    %72 = vector.broadcast %71 : vector<1x256xi1> to vector<8x256xi1>
    %73 = arith.select %72, %69, %70 : vector<8x256xi1>, vector<8x256xbf16>
    %74 = vector.extract_strided_slice %68 {offsets = [0, 1], sizes = [8, 256], strides = [1, 1]} : vector<8x290xbf16> to vector<8x256xbf16>
    %75 = vector.extract_strided_slice %68 {offsets = [0, 2], sizes = [8, 256], strides = [1, 1]} : vector<8x290xbf16> to vector<8x256xbf16>
    %cst_20 = arith.constant 0.000000e+00 : bf16
    %76 = vector.broadcast %cst_20 : bf16 to vector<8x256xbf16>
    %77 = vector.shape_cast %20 : vector<1x256xi1> to vector<1x256xi1>
    %78 = vector.broadcast %77 : vector<1x256xi1> to vector<8x256xi1>
    %79 = arith.select %78, %75, %76 : vector<8x256xi1>, vector<8x256xbf16>
    %80 = vector.extract_strided_slice %68 {offsets = [0, 16], sizes = [8, 256], strides = [1, 1]} : vector<8x290xbf16> to vector<8x256xbf16>
    %cst_21 = arith.constant 0.000000e+00 : bf16
    %81 = vector.broadcast %cst_21 : bf16 to vector<8x256xbf16>
    %82 = vector.shape_cast %18 : vector<1x256xi1> to vector<1x256xi1>
    %83 = vector.broadcast %82 : vector<1x256xi1> to vector<8x256xi1>
    %84 = arith.select %83, %80, %81 : vector<8x256xi1>, vector<8x256xbf16>
    %85 = vector.extract_strided_slice %68 {offsets = [0, 17], sizes = [8, 256], strides = [1, 1]} : vector<8x290xbf16> to vector<8x256xbf16>
    %86 = vector.extract_strided_slice %68 {offsets = [0, 18], sizes = [8, 256], strides = [1, 1]} : vector<8x290xbf16> to vector<8x256xbf16>
    %cst_22 = arith.constant 0.000000e+00 : bf16
    %87 = vector.broadcast %cst_22 : bf16 to vector<8x256xbf16>
    %88 = vector.shape_cast %20 : vector<1x256xi1> to vector<1x256xi1>
    %89 = vector.broadcast %88 : vector<1x256xi1> to vector<8x256xi1>
    %90 = arith.select %89, %86, %87 : vector<8x256xi1>, vector<8x256xbf16>
    %91 = vector.extract_strided_slice %68 {offsets = [0, 32], sizes = [8, 256], strides = [1, 1]} : vector<8x290xbf16> to vector<8x256xbf16>
    %cst_23 = arith.constant 0.000000e+00 : bf16
    %92 = vector.broadcast %cst_23 : bf16 to vector<8x256xbf16>
    %93 = vector.shape_cast %18 : vector<1x256xi1> to vector<1x256xi1>
    %94 = vector.broadcast %93 : vector<1x256xi1> to vector<8x256xi1>
    %95 = arith.select %94, %91, %92 : vector<8x256xi1>, vector<8x256xbf16>
    %96 = vector.extract_strided_slice %68 {offsets = [0, 33], sizes = [8, 256], strides = [1, 1]} : vector<8x290xbf16> to vector<8x256xbf16>
    %97 = vector.extract_strided_slice %68 {offsets = [0, 34], sizes = [8, 256], strides = [1, 1]} : vector<8x290xbf16> to vector<8x256xbf16>
    %cst_24 = arith.constant 0.000000e+00 : bf16
    %98 = vector.broadcast %cst_24 : bf16 to vector<8x256xbf16>
    %99 = vector.shape_cast %20 : vector<1x256xi1> to vector<1x256xi1>
    %100 = vector.broadcast %99 : vector<1x256xi1> to vector<8x256xi1>
    %101 = arith.select %100, %97, %98 : vector<8x256xi1>, vector<8x256xbf16>
    %102 = tpu.concatenate %73, %74, %79, %84, %85, %90, %95, %96, %101 in 0 : vector<8x256xbf16>, vector<8x256xbf16>, vector<8x256xbf16>, vector<8x256xbf16>, vector<8x256xbf16>, vector<8x256xbf16>, vector<8x256xbf16>, vector<8x256xbf16>, vector<8x256xbf16> -> vector<72x256xbf16>
    %c0_25 = arith.constant 0 : index
    %c0_26 = arith.constant 0 : index
    %103 = vector.load %arg4[%c0_25, %c0_26] : memref<8x72xbf16, #tpu.memory_space<vmem>>, vector<8x72xbf16>
    %cst_27 = arith.constant dense<0.000000e+00> : vector<8x256xf32>
    %104 = tpu.matmul %103, %102, %cst_27 {dimension_numbers = #tpu.dot_dimension_numbers<[1], [0], [0], [1], [0, 0, 1, 1], [], []>} : vector<8x72xbf16>, vector<72x256xbf16>, vector<8x256xf32> -> vector<8x256xf32>
    %c0_28 = arith.constant 0 : index
    %c0_29 = arith.constant 0 : index
    %105 = vector.load %arg5[%c0_28, %c0_29] : memref<8x1xf32, #tpu.memory_space<vmem>>, vector<8x1xf32>
    %106 = vector.broadcast %105 : vector<8x1xf32> to vector<8x256xf32>
    %107 = arith.addf %104, %106 : vector<8x256xf32>
    %cst_30 = arith.constant 0.000000e+00 : f32
    %108 = vector.broadcast %cst_30 : f32 to vector<8x256xf32>
    %109 = arith.maximumf %107, %108 : vector<8x256xf32>
    %110 = arith.truncf %109 : vector<8x256xf32> to vector<8x256xbf16>
    %c0_31 = arith.constant 0 : index
    %c0_32 = arith.constant 0 : index
    %111 = vector.load %arg6[%c0_31, %c0_32] : memref<256x1024xbf16, #tpu.memory_space<vmem>>, vector<256x1024xbf16>
    %cst_33 = arith.constant dense<0.000000e+00> : vector<8x1024xf32>
    %112 = tpu.matmul %110, %111, %cst_33 {dimension_numbers = #tpu.dot_dimension_numbers<[1], [0], [0], [1], [0, 0, 1, 1], [], []>} : vector<8x256xbf16>, vector<256x1024xbf16>, vector<8x1024xf32> -> vector<8x1024xf32>
    %113 = vector.shape_cast %112 : vector<8x1024xf32> to vector<1x8x1024xf32>
    %c0_34 = arith.constant 0 : index
    %c0_35 = arith.constant 0 : index
    %c0_36 = arith.constant 0 : index
    %114 = vector.load %arg7[%c0_34, %c0_35, %c0_36] : memref<1x8x1024xf32, #tpu.memory_space<vmem>>, vector<1x8x1024xf32>
    tpu.vector_store %arg7[%c0_34, %c0_35, %c0_36], %113 {strides = array<i32>} : memref<1x8x1024xf32, #tpu.memory_space<vmem>>, vector<1x8x1024xf32>,
    return
  }
  func.func @transform_0(%arg0: i32) -> (i32, i32, i32) {
    %c0_i32 = arith.constant 0 : i32
    %c0_i32_0 = arith.constant 0 : i32
    %c0_i32_1 = arith.constant 0 : i32
    return %arg0, %c0_i32, %c0_i32_0 : i32, i32, i32
  }
  func.func @transform_1(%arg0: i32) -> (i32, i32) {
    %c0_i32 = arith.constant 0 : i32
    %c0_i32_0 = arith.constant 0 : i32
    %c0_i32_1 = arith.constant 0 : i32
    return %c0_i32, %c0_i32_0 : i32, i32
  }
  func.func @transform_2(%arg0: i32) -> (i32, i32) {
    %c0_i32 = arith.constant 0 : i32
    %c0_i32_0 = arith.constant 0 : i32
    %c0_i32_1 = arith.constant 0 : i32
    return %c0_i32, %c0_i32_0 : i32, i32
  }
  func.func @transform_3(%arg0: i32) -> (i32, i32) {
    %c0_i32 = arith.constant 0 : i32
    %c0_i32_0 = arith.constant 0 : i32
    %c0_i32_1 = arith.constant 0 : i32
    return %c0_i32, %c0_i32_0 : i32, i32
  }
  func.func @transform_4(%arg0: i32) -> (i32, i32) {
    %c0_i32 = arith.constant 0 : i32
    %c0_i32_0 = arith.constant 0 : i32
    %c0_i32_1 = arith.constant 0 : i32
    return %c0_i32, %c0_i32_0 : i32, i32
  }
  func.func @transform_5(%arg0: i32) -> (i32, i32) {
    %c0_i32 = arith.constant 0 : i32
    %c0_i32_0 = arith.constant 0 : i32
    %c0_i32_1 = arith.constant 0 : i32
    return %c0_i32, %c0_i32_0 : i32, i32
  }
  func.func @transform_6(%arg0: i32) -> (i32, i32, i32) {
    %c0_i32 = arith.constant 0 : i32
    %c0_i32_0 = arith.constant 0 : i32
    %c0_i32_1 = arith.constant 0 : i32
    return %arg0, %c0_i32, %c0_i32_0 : i32, i32, i32
  }
}

</mosaic_0001>

<bundles_post_ra>
// kernel: tpu_custom_call.1
= control target key start
LH: loop header
LB: loop body
LE: loop exit
PB: predicated region body
PF: predicated region fallthrough
CT: control target
= control target key end

     0   :  { %11 = vsyncpa [#allocation3], 0  ;;  %s2670_s0 = inlined_call_operand.vmem [shape: bf16[2,8,256], index: 0, kind: input, shape index: {}]   ;;  %s2671_s1 = inlined_call_operand.vmem [shape: bf16[8,72], index: 1, kind: input, shape index: {}]   ;;  %s2672_s2 = inlined_call_operand.vmem [shape: f32[8,1], index: 2, kind: input, shape index: {}]   ;;  %s2673_s3 = inlined_call_operand.vmem [shape: bf16[8,72], index: 3, kind: input, shape index: {}]   ;;  %s2674_s4 = inlined_call_operand.vmem [shape: f32[8,1], index: 4, kind: input, shape index: {}]   ;;  %s2675_s5 = inlined_call_operand.hbm [shape: bf16[256,1024], index: 5, kind: input, shape index: {}]   ;;  %s2676_s6 = inlined_call_operand.hbm [shape: f32[2,8,1024], index: 6, kind: output, shape index: {}]  }
   0x1   :  { %12 = vsyncpa [#allocation4], 0 }
   0x2   :  { %14 = vsyncpa [#allocation4 + $0x1], 0  ;;  %s2215_s21 = smov 0   ;;  %s2217_s22 = smov 0  }
   0x3   :  { %s2219_s23 = smov 0   ;;  %s2221_s24 = smov 0  }
   0x4 LB: > { %s2236_s25 = sadd.s32 4294967295, %s2159_s24   ;;  %s1845_s26 = sadd.s32 4294967294, %s2159_s24   ;;  %s2159_s24 = sphi %s2221_s24, %s2720_s24   ;;  %s2155_s23 = sphi %s2219_s23, %s2719_s23   ;;  %s2151_s22 = sphi %s2217_s22, %s2718_s22   ;;  %s2147_s21 = sphi %s2215_s21, %s2717_s21  }
   0x5   : > { %s2240_s27 = sadd.s32 1, %s2159_s24   ;;  %s158_s28 = sadd.s32 1, %s2155_s23 }
   0x6   : > { %s155_s29 = ssub.s32 %s2159_s24, %s2240_s27  ;;  %p168_p0 = scmp.ne.s32.totalorder %s2155_s23, %s2151_s22 }
   0x7   : > { %p156_p1 = scmp.eq.s32.totalorder %s155_s29, 0  ;;  %p169_p2 = scmp.eq.s32.totalorder %s2236_s25, 1 }
   0x8   : > { %p174_p3 = scmp.ne.s32.totalorder %s2151_s22, %s2147_s21  ;;  %p175_p4 = scmp.eq.s32.totalorder %s1845_s26, 1 }
   0x9   : > { %s2251_s30 = scalar_select %p156_p1, %s2155_s23, %s158_s28  }
   0xa   : > { %p2253_p5 = por %p169_p2, %p168_p0  ;;  %p2257_p6 = por %p175_p4, %p174_p3 }
   0xb   : > { %p1846_p7 = scmp.ge.s32.totalorder %s2159_s24, 1  ;;  %p182_p8 = scmp.lt.s32.totalorder %s2159_s24, 3 }
   0xc   : > { %s2692_s7 = scalar_select %p2253_p5, 1, 0 }
   0xd   : > { %s2693_s8 = scalar_select %p2257_p6, 1, 0 }
   0xe   : > { %p2677_p9 = scmp.eq.s32.totalorder %s2236_s25, 0  ;;  %p2264_p10 = pnand %p1846_p7, %p182_p8 }
   0xf   : > { %s2161_s10 = smov [#allocation2]   ;;  %s2065_s15 = scalar_lea.hbm %s2675_s5, 16384 }
  0x10   : > { %s2694_s9 = scalar_select %p2264_p10, 1, 0 }
  0x11   : > { %s206_s11 = sshll.u32 %s2161_s10, 4  ;;  %p2001_p11 = pneg %p2264_p10  ;;  %s207_s11 = int_to_ptr.vmem [resolvable:$true] %s206_s11 }
  0x12   : > { %p2066_p13 = scmp.ne.s32.totalorder %s2675_s5, %s2065_s15  ;;  %p2072_p3 = scmp.lt.u32.totalorder %s2065_s15, %s2675_s5 }
  0x13   : > { %p2272_p12 = pnand %p2677_p9, %p2001_p11 }
  0x15   : > { %p2067_p0 = pneg %p2272_p12 }
  0x17   : > { %p2068_p1 = pnand %p2067_p0, %p2066_p13 }
  0x19   : > { %p2069_p2 = pneg %p2068_p1 }
  0x1b   : > { %p2074_p4 = pnand %p2072_p3, %p2069_p2 }
  0x1d   : > { %2077 = shalt.err (!%p2074_p4)
}
  0x1e   : > { %s2078_s20 = scalar_lea.vmem %s207_s11, 16384  ;;  %p2086_p9 = scmp.lt.s32.totalorder %s207_s11, %s207_s11 }
  0x1f   : > { %p2079_p7 = scmp.ne.s32.totalorder %s207_s11, %s2078_s20  ;;  %p2087_p6 = scmp.lt.s32.totalorder %s2078_s20, %s2078_s20 }
  0x21   : > { %p2081_p8 = pnand %p2079_p7, %p2067_p0  ;;  %p2088_p5 = por %p2087_p6, %p2086_p9 }
  0x23   : > { %p2082_p11 = pneg %p2081_p8 }
  0x25   : > { %p2089_p10 = pnand %p2088_p5, %p2082_p11 }
  0x27   : > { %2092 = shalt.err (!%p2089_p10)
}
  0x28   : > { %s2162_s26 = smov 512   ;;  %s2163_s28 = smov 32  }
  0x29   : > { %2004 = dma.hbm_to_vmem [thread:$0]  (!%p2272_p12), %s2675_s5, 16384, %s207_s11, [#allocation3], %s2162_s26, %s2162_s26, %s2163_s28  }
  0x2a   : > { %p2696_p13 = scmp.ne.s32.totalorder %s2694_s9, 0 }
  0x2b   : > { %p2697_p1 = scmp.eq.s32.totalorder (!%p2696_p13), %s2236_s25, 0 }
  0x2c   : > { %230 = sbr.rel (%p2696_p13) target bundleno = 1359 (0x54f), region = 44 }
  0x33   : > { %2138 = dma.done.wait (%p2697_p1), [#allocation3], 16384   ;;  %p2698_p0 = pmov %p2697_p1 }
  0x34   : > { %p260_p5 = scmp.lt.s32.totalorder %s2236_s25, 1  ;;  %v268_v0 = vlaneseq  ;;  %v2164_v1 = vmov 0   ;;  %s2165_s15 = smov 17   ;;  %vm309_vm6 = vcmask 138240   ;;  %vm356_vm7 = vcmask 15360   ;;  %v544_v62 = vld [vmem:[%s2672_s2] sm:$0xff] }
  0x35   : > { %2140 = vsyncadd (%p2698_p0), [#allocation3], 4294950912  ;;  %592 = vmatprep.mubr.bf16.mxu0 %v2164_v1  ;;  %2062 = vset.pattern.permute.xlu0 %v2164_v1  ;;  %s2166_s16 = smov 16   ;;  %s2167_s17 = smov 2   ;;  %vm368_vm10 = vcmask 130048   ;;  %vm392_vm11 = vcmask 261120  }
  0x36   : > { %s261_s12 = scalar_select %p260_p5, %s2236_s25, 1  ;;  %v269_v2 = vand.u32 127, %v268_v0  ;;  %806 = vmatprep.mubr.bf16.mxu1 %v2164_v1  ;;  %v327_v3 = vshrl.u32 %v268_v0, 7  ;;  %vm380_vm15 = vcmask 146432  }
  0x37   : > { %s2168_s18 = smov 18   ;;  %s2169_s19 = smov 32  }
  0x38   : > { %s1993_s11 = sshll.u32 %s261_s12, 3  ;;  %v270_v4 = vadd.s32 128, %v269_v2  ;;  %v275_v5 = vand.u32 15, %v269_v2  ;;  %v328_v8 = vsub.s32 0, %v327_v3  ;;  %v332_v10 = vsub.s32 4, %v327_v3  ;;  %s2170_s20 = smov 34  }
  0x39   : > { %s264_s14 = scalar_lea.vmem %s2670_s0, %s1993_s11  ;;  %s2171_s26 = smov 111  }
  0x3a   : > { %v282_v6 = vand.u32 15, %v270_v4  ;;  %vm295_vm0 = vcmp.ge.s32.totalorder %v275_v5, 1  ;;  %v299_v7 = vld [vmem:[%s264_s14] sm:$0xff]  ;;  %vm297_vm1 = vcmp.le.s32.totalorder %v275_v5, 14  ;;  %s2172_s28 = smov 127   ;;  %s2173_s29 = smov 95  }
  0x3b   : > { %v1854_v9 = vcombine.low %v299_v7, %v299_v7  ;;  %v1855_v11 = vcombine.high %v299_v7, %v299_v7  ;;  %s2174_s10 = smov 126   ;;  %s2175_s12 = smov 96  }
  0x3c   : > { %vm296_vm2 = vcmp.ge.s32.totalorder %v282_v6, 1  ;;  %vm298_vm3 = vcmp.le.s32.totalorder %v282_v6, 14  ;;  %s2176_s11 = smov 112   ;;  %s2177_s9 = smov 110  }
  0x3d   : > { %vm324_vm4 = vmpackc.low %vm296_vm2, %vm295_vm0  ;;  %305 = vrot.lane.b32.xlu0 %v1854_v9, %s2165_s15  ;;  %s2178_s13 = smov 94   ;;  %p2715_p9 = scmp.ne.s32.totalorder %s2692_s7, 0 }
  0x3e   : > { %v325_v12 = vsel %vm324_vm4, 65537, %v2164_v1  ;;  %vm342_vm5 = vmpackc.low %vm298_vm3, %vm297_vm1 }
  0x3f   : > { %v2304_v13 = vrot.slane %v325_v12, %v328_v8  ;;  %v343_v14 = vsel %vm342_vm5, 65537, %v2164_v1  ;;  %v2307_v15 = vrot.slane %v325_v12, %v332_v10 }
  0x40   : > { %v347_v16 = vrot.slane %v343_v14, %v328_v8  ;;  %v351_v17 = vrot.slane %v343_v14, %v332_v10 }
  0x41   : > { %364 = vrot.lane.b32.xlu1 %v2304_v13, %s2166_s16  ;;  %307 = vrot.lane.b32.xlu0 %v1855_v11, %s2165_s15 }
  0x45   : > { %366 = vrot.lane.b32.xlu1 %v2307_v15, %s2166_s16  ;;  %352 = vrot.lane.b32.xlu0 %v347_v16, %s2167_s17 }
  0x49   : > { %354 = vrot.lane.b32.xlu1 %v351_v17, %s2167_s17  ;;  %376 = vrot.lane.b32.xlu0 %v347_v16, %s2168_s18  ;;  %s2179_s17 = smov [#allocation5]  }
  0x4d   : > { %378 = vrot.lane.b32.xlu1 %v351_v17, %s2168_s18  ;;  %388 = vrot.lane.b32.xlu0 %v2304_v13, %s2169_s19  ;;  %s2097_s18 = sshll.u32 %s2179_s17, 4  ;;  %s2098_s18 = int_to_ptr.vmem [resolvable:$false] %s2097_s18 }
  0x51   : > { %390 = vrot.lane.b32.xlu1 %v2307_v15, %s2169_s19  ;;  %400 = vrot.lane.b32.xlu0 %v347_v16, %s2170_s20 }
  0x55   : > { %402 = vrot.lane.b32.xlu1 %v351_v17, %s2170_s20 }
  0xaf   : > { %v306_v18 = vpop.permute.xlu0 %305 }
  0xb0   : > { %v2329_v25 = vsel %vm309_vm6, 0, %v306_v18 }
  0xb1   : > { %v414_v29 = vrot.slane %v2329_v25, 4 }
  0xb3   : > { %v2313_v19 = vpop.permute.xlu1 %364  ;;  %v308_v20 = vpop.permute.xlu0 %307 }
  0xb4   : > { %v2316_v21 = vsel %vm309_vm6, %v306_v18, %v308_v20  ;;  %v2319_v22 = vsel %vm309_vm6, %v308_v20, 0  ;;  %vm370_vm0 = vcmp.ne.s16.totalorder %v2313_v19, 0 }
  0xb5   : > { %457 = vrot.lane.b32.xlu0 %v2319_v22, %s2171_s26  ;;  %455 = vrot.lane.b32.xlu1 %v2316_v21, %s2171_s26  ;;  %v415_v24 = vrot.slane %v2316_v21, 4  ;;  %v416_v28 = vrot.slane %v2319_v22, 4  ;;  %v373_v44 = vsel %vm370_vm0, %v2329_v25, 0 }
  0xb6   : > { %v441_v47 = vrot.slane %v373_v44, 4 }
  0xb7   : > { %v2325_v23 = vpop.permute.xlu1 %366  ;;  %v2331_v26 = vpop.permute.xlu0 %352 }
  0xb8   : > { %vm358_vm8 = vcmp.ne.s16.totalorder %v2331_v26, 0  ;;  %vm372_vm12 = vcmp.ne.s16.totalorder %v2325_v23, 0  ;;  %v2373_v37 = vsel %vm368_vm10, %v2313_v19, %v2325_v23  ;;  %vm404_vm10 = vcmask 277504  }
  0xb9   : > { %453 = vrot.lane.b32.xlu1 %v2329_v25, %s2171_s26  ;;  %419 = vrot.lane.b32.xlu0 %v415_v24, %s2172_s28  ;;  %v361_v35 = vsel %vm358_vm8, %v2329_v25, 0  ;;  %v375_v39 = vsel %vm372_vm12, %v2319_v22, 0  ;;  %vm371_vm1 = vcmp.ne.s16.totalorder %v2373_v37, 0 }
  0xba   : > { %v443_v43 = vrot.slane %v375_v39, 4  ;;  %v374_v45 = vsel %vm371_vm1, %v2316_v21, 0 }
  0xbb   : > { %v2336_v27 = vpop.permute.xlu1 %354  ;;  %v2346_v31 = vpop.permute.xlu0 %376  ;;  %v442_v48 = vrot.slane %v374_v45, 4 }
  0xbc   : > { %vm360_vm9 = vcmp.ne.s16.totalorder %v2336_v27, 0  ;;  %v2354_v32 = vsel %vm356_vm7, %v2331_v26, %v2336_v27  ;;  %vm382_vm5 = vcmp.ne.s16.totalorder %v2346_v31, 0 }
  0xbd   : > { %421 = vrot.lane.b32.xlu1 %v416_v28, %s2172_s28  ;;  %417 = vrot.lane.b32.xlu0 %v414_v29, %s2172_s28  ;;  %v363_v34 = vsel %vm360_vm9, %v2319_v22, 0  ;;  %vm359_vm13 = vcmp.ne.s16.totalorder %v2354_v32, 0  ;;  %v385_v53 = vsel %vm382_vm5, %v2329_v25, 0 }
  0xbe   : > { %v362_v41 = vsel %vm359_vm13, %v2316_v21, 0  ;;  %v465_v55 = vrot.slane %v385_v53, 4 }
  0xbf   : > { %v2344_v30 = vpop.permute.xlu1 %378  ;;  %v2366_v36 = vpop.permute.xlu0 %388 }
  0xc0   : > { %v2395_v42 = vsel %vm380_vm15, %v2346_v31, %v2344_v30  ;;  %vm2680_vm4 = vcmp.ne.s16.totalorder %v2344_v30, 0  ;;  %vm2683_vm7 = vcmp.ne.s16.totalorder %v2366_v36, 0 }
  0xc1   : > { %491 = vrot.lane.b32.xlu1 %v415_v24, %s2173_s29  ;;  %493 = vrot.lane.b32.xlu0 %v416_v28, %s2173_s29  ;;  %vm2688_vm3 = vcmp.ne.s16.totalorder %v2395_v42, 0  ;;  %v387_v50 = vsel %vm2680_vm4, %v2319_v22, 0  ;;  %v397_v57 = vsel %vm2683_vm7, %v2329_v25, 0  ;;  %vm510_vm7 = vcmask 1043456  }
  0xc2   : > { %v386_v49 = vsel %vm2688_vm3, %v2316_v21, 0  ;;  %v467_v52 = vrot.slane %v387_v50, 4  ;;  %vm486_vm3 = vcmask 785408  }
  0xc3   : > { %v2356_v33 = vpop.permute.xlu1 %390  ;;  %v466_v51 = vrot.slane %v386_v49, 4  ;;  %v2425_v54 = vpop.permute.xlu0 %400 }
  0xc4   : > { %vm396_vm14 = vcmp.ne.s16.totalorder %v2356_v33, 0  ;;  %v2377_v38 = vsel %vm392_vm11, %v2366_v36, %v2356_v33  ;;  %vm2682_vm11 = vcmp.ne.s16.totalorder %v2425_v54, 0 }
  0xc5   : > { %433 = vrot.lane.b32.xlu0 %v363_v34, %s2174_s10  ;;  %429 = vrot.lane.b32.xlu1 %v361_v35, %s2174_s10  ;;  %v399_v40 = vsel %vm396_vm14, %v2319_v22, 0  ;;  %vm395_vm2 = vcmp.ne.s16.totalorder %v2377_v38, 0  ;;  %v409_v59 = vsel %vm2682_vm11, %v2329_v25, 0  ;;  %vm2686_vm11 = vcmp.ne.s16.totalorder %v2304_v13, 0 }
  0xc6   : > { %v398_v46 = vsel %vm395_vm2, %v2316_v21, 0  ;;  %v336_v8 = vsel %vm2686_vm11, %v2329_v25, 0  ;;  %vm459_vm11 = vcmask 908288  }
  0xc7   : > { %v2427_v56 = vpop.permute.xlu1 %402 }
  0xc8   : > { %v2437_v58 = vsel %vm404_vm10, %v2425_v54, %v2427_v56  ;;  %vm2681_vm4 = vcmp.ne.s16.totalorder %v2427_v56, 0  ;;  %vm2684_vm10 = vcmask 1039360  }
  0xc9   : > { %484 = vrot.lane.b32.xlu0 %v399_v40, %s2175_s12  ;;  %431 = vrot.lane.b32.xlu1 %v362_v41, %s2174_s10  ;;  %vm2687_vm15 = vcmp.ne.s16.totalorder %v2437_v58, 0  ;;  %v411_v60 = vsel %vm2681_vm4, %v2319_v22, 0  ;;  %vm2685_vm4 = vcmp.ne.s16.totalorder %v2307_v15, 0 }
  0xca   : > { %v410_v61 = vsel %vm2687_vm15, %v2316_v21, 0  ;;  %v337_v7 = vsel %vm2685_vm4, %v2316_v21, 0  ;;  %vm2690_vm4 = vcmask 916480   ;;  %vm474_vm15 = vcmask 900096  }
  0xcd   : > { %448 = vrot.lane.b32.xlu0 %v443_v43, %s2176_s11  ;;  %482 = vrot.lane.b32.xlu1 %v398_v46, %s2175_s12 }
  0xd1   : > { %444 = vrot.lane.b32.xlu0 %v441_v47, %s2176_s11  ;;  %446 = vrot.lane.b32.xlu1 %v442_v48, %s2176_s11 }
  0xd5   : > { %472 = vrot.lane.b32.xlu0 %v467_v52, %s2177_s9  ;;  %470 = vrot.lane.b32.xlu1 %v466_v51, %s2177_s9 }
  0xd9   : > { %468 = vrot.lane.b32.xlu0 %v465_v55, %s2177_s9  ;;  %480 = vrot.lane.b32.xlu1 %v397_v57, %s2175_s12 }
  0xdd   : > { %489 = vrot.lane.b32.xlu0 %v414_v29, %s2173_s29  ;;  %501 = vrot.lane.b32.xlu1 %v409_v59, %s2178_s13 }
  0xe1   : > { %505 = vrot.lane.b32.xlu1 %v411_v60, %s2178_s13  ;;  %503 = vrot.lane.b32.xlu0 %v410_v61, %s2178_s13 }
  0xe5   : > { %547 = vperm.xlu0 %2062, %v544_v62  }
 0x127   : > { %v456_v63 = vpop.permute.xlu1 %455  ;;  %v458_v0 = vpop.permute.xlu0 %457 }
 0x128   : > { %v461_v43 = vsel %vm459_vm11, %v456_v63, %v458_v0 }
 0x12b   : > { %v454_v1 = vpop.permute.xlu1 %453  ;;  %v420_v2 = vpop.permute.xlu0 %419 }
 0x12c   : > { %v460_v49 = vsel %vm459_vm11, %v454_v1, %v456_v63 }
 0x12f   : > { %v422_v3 = vpop.permute.xlu1 %421  ;;  %v418_v4 = vpop.permute.xlu0 %417 }
 0x130   : > { %v425_v5 = vsel %vm2684_vm10, %v420_v2, %v422_v3  ;;  %v424_v6 = vsel %vm2684_vm10, %v418_v4, %v420_v2  ;;  %vm2689_vm10 = vcmask 1031168   ;;  %v543_v3 = vld [vmem:[%s2671_s1] sm:$0xf] }
 0x131   : > { %v517_v9 = vsel %vm510_vm7, %v337_v7, %v425_v5  ;;  %v513_v10 = vsel %vm510_vm7, %v336_v8, %v424_v6 }
 0x132   : > { %560 = vmatprep.subr.bf16.mxu0 %v517_v9 }
 0x133   : > { %v492_v11 = vpop.permute.xlu1 %491  ;;  %561 = vmatpush1.bf16.msra.mxu0 %v513_v10  ;;  %v494_v12 = vpop.permute.xlu0 %493 }
 0x137   : > { %v430_v14 = vpop.permute.xlu1 %429  ;;  %v434_v16 = vpop.permute.xlu0 %433 }
 0x13b   : > { %v432_v17 = vpop.permute.xlu1 %431  ;;  %v485_v18 = vpop.permute.xlu0 %484 }
 0x13c   : > { %v436_v25 = vsel %vm2689_vm10, %v430_v14, %v432_v17  ;;  %v437_v28 = vsel %vm2689_vm10, %v432_v17, %v434_v16  ;;  %vm2691_vm10 = vcmask 777216  }
 0x13d   : > { %v497_v51 = vsel %vm2691_vm10, %v492_v11, %v494_v12 }
 0x13f   : > { %v483_v20 = vpop.permute.xlu1 %482  ;;  %v449_v22 = vpop.permute.xlu0 %448 }
 0x140   : > { %v488_v46 = vsel %vm486_vm3, %v483_v20, %v485_v18 }
 0x141   : > { %v541_v53 = vsel %vm510_vm7, %v488_v46, %v497_v51  ;;  %v819_v46 = vld [vmem:[#allocation2] sm:$0xff] }
 0x143   : > { %v447_v21 = vpop.permute.xlu1 %446  ;;  %v445_v24 = vpop.permute.xlu0 %444 }
 0x144   : > { %v452_v29 = vsel %vm2690_vm4, %v447_v21, %v449_v22  ;;  %v451_v34 = vsel %vm2690_vm4, %v445_v24, %v447_v21  ;;  %vm507_vm4 = vcmask 769024  }
 0x145   : > { %v525_v35 = vsel %vm510_vm7, %v437_v28, %v452_v29  ;;  %v521_v39 = vsel %vm510_vm7, %v436_v25, %v451_v34 }
 0x146   : > { %562 = vmatprep.subr.bf16.mxu0 %v525_v35 }
 0x147   : > { %v471_v40 = vpop.permute.xlu1 %470  ;;  %563 = vmatpush1.bf16.msra.mxu0 %v521_v39  ;;  %v473_v41 = vpop.permute.xlu0 %472 }
 0x148   : > { %v476_v44 = vsel %vm474_vm15, %v471_v40, %v473_v41 }
 0x149   : > { %v533_v45 = vsel %vm510_vm7, %v461_v43, %v476_v44 }
 0x14a   : > { %564 = vmatprep.subr.bf16.mxu0 %v533_v45 }
 0x14b   : > { %v481_v47 = vpop.permute.xlu1 %480  ;;  %v469_v48 = vpop.permute.xlu0 %468 }
 0x14c   : > { %v475_v50 = vsel %vm474_vm15, %v469_v48, %v471_v40  ;;  %v487_v59 = vsel %vm486_vm3, %v481_v47, %v483_v20  ;;  %v823_v47 = vld [vmem:[#allocation2 + $0x20] sm:$0xff] }
 0x14d   : > { %v529_v52 = vsel %vm510_vm7, %v460_v49, %v475_v50  ;;  %v1860_v48 = vcombine.low %v819_v46, %v823_v47  ;;  %v827_v49 = vld [vmem:[#allocation2 + $0x40] sm:$0xff] }
 0x14e   : > { %565 = vmatpush1.bf16.msra.mxu0 %v529_v52  ;;  %v831_v50 = vld [vmem:[#allocation2 + $0x60] sm:$0xff] }
 0x14f   : > { %v502_v55 = vpop.permute.xlu1 %501  ;;  %566 = vmatprep.subr.bf16.mxu0 %v541_v53  ;;  %v490_v57 = vpop.permute.xlu0 %489  ;;  %v1869_v51 = vcombine.high %v827_v49, %v831_v50  ;;  %v835_v52 = vld [vmem:[#allocation2 + $0x80] sm:$0xff] }
 0x150   : > { %v496_v60 = vsel %vm2691_vm10, %v490_v57, %v492_v11  ;;  %vm550_vm10 = vcmask 588800   ;;  %v839_v53 = vld [vmem:[#allocation2 + $0xa0] sm:$0xff] }
 0x151   : > { %v537_v61 = vsel %vm510_vm7, %v487_v59, %v496_v60  ;;  %v843_v57 = vld [vmem:[#allocation2 + $0xc0] sm:$0xff]  ;;  %v1876_v60 = vcombine.low %v835_v52, %v839_v53 }
 0x152   : > { %567 = vmatpush1.bf16.msra.mxu0 %v537_v61  ;;  %v847_v59 = vld [vmem:[#allocation2 + $0xe0] sm:$0xff] }
 0x153   : > { %v506_v62 = vpop.permute.xlu1 %505  ;;  %v504_v63 = vpop.permute.xlu0 %503  ;;  %v1885_v61 = vcombine.high %v843_v57, %v847_v59 }
 0x154   : > { %v508_v0 = vsel %vm507_vm4, %v502_v55, %v504_v63  ;;  %v509_v1 = vsel %vm507_vm4, %v504_v63, %v506_v62  ;;  %v1877_v55 = vcombine.high %v835_v52, %v839_v53  ;;  %v851_v62 = vld [vmem:[#allocation2 + $0x100] sm:$0xff] }
 0x155   : > { %1856 = vmatprep.subr.msk.bf16.mxu0 %vm510_vm7, %v509_v1  ;;  %v555_v2 = vsel %vm510_vm7, %v508_v0, 0  ;;  %v855_v63 = vld [vmem:[#allocation2 + $0x120] sm:$0xff]  ;;  %v1884_v0 = vcombine.low %v843_v57, %v847_v59 }
 0x156   : > { %569 = vmatpush1.bf16.msra.mxu0 %v555_v2  ;;  %v1893_v1 = vcombine.high %v851_v62, %v855_v63  ;;  %v859_v2 = vld [vmem:[#allocation2 + $0x140] sm:$0xff] }
 0x159   : > { %1857 = vmatmul.mubr.msk.bf16.vlgmr.msra.gmra.mrb[0].mxu0 %vm550_vm10, %v543_v3  ;;  %v863_v3 = vld [vmem:[#allocation2 + $0x160] sm:$0xff] }
 0x164   : > { %v548_v4 = vpop.permute.xlu0 %547 }
 0x22c   : > { %v594_v5 = vpop.f32.mrb[0].mxu0 }
 0x22d   : > { %v595_v6 = vadd.f32 %v594_v5, %v548_v4  ;;  %v596_v7 = vpop.f32.mrb[1].mxu0  ;;  %v1901_v5 = vcombine.high %v859_v2, %v863_v3 }
 0x22e   : > { %v597_v8 = vadd.f32 %v596_v7, %v548_v4  ;;  %v598_v9 = vpop.f32.mrb[2].mxu0  ;;  %v1892_v4 = vcombine.low %v851_v62, %v855_v63  ;;  %v871_v7 = vld [vmem:[#allocation2 + $0x1a0] sm:$0xff] }
 0x22f   : > { %v601_v10 = vmax.f32 %v595_v6, 0.0  ;;  %v599_v11 = vpop.f32.mrb[3].mxu0  ;;  %v867_v6 = vld [vmem:[#allocation2 + $0x180] sm:$0xff] }
 0x230   : > { %v602_v14 = vmax.f32 %v597_v8, 0.0  ;;  %v1900_v8 = vcombine.low %v859_v2, %v863_v3  ;;  %v1909_v9 = vcombine.high %v867_v6, %v871_v7  ;;  %v879_v11 = vld [vmem:[#allocation2 + $0x1e0] sm:$0xff] }
 0x231   : > { %v603_v12 = vpack.c.bf16 %v601_v10, %v601_v10  ;;  %v875_v10 = vld [vmem:[#allocation2 + $0x1c0] sm:$0xff] }
 0x232   : > { %v604_v16 = vpack.c.bf16 %v602_v14, %v602_v14  ;;  %v1917_v14 = vcombine.high %v875_v10, %v879_v11 }
 0x233   : > { %607 = vrot.lane.b32.xlu1 %v603_v12, %s2165_s15  ;;  %v1908_v12 = vcombine.low %v867_v6, %v871_v7 }
 0x237   : > { %609 = vrot.lane.b32.xlu1 %v604_v16, %s2165_s15  ;;  %v883_v16 = vld [vmem:[#allocation2 + $0x200] sm:$0xff]  ;;  %s2099_s15 = scalar_lea.vmem %s2098_s18, 2048 }
 0x2a5   : > { %v608_v17 = vpop.permute.xlu1 %607 }
 0x2a6   : > { %v2500_v18 = vsel %vm309_vm6, 0, %v608_v17 }
 0x2a7   : > { %674 = vrot.lane.b32.xlu1 %v2500_v18, %s2171_s26  ;;  %v621_v21 = vsel %vm358_vm8, %v2500_v18, 0  ;;  %v638_v24 = vrot.slane %v2500_v18, 4  ;;  %v624_v32 = vsel %vm370_vm0, %v2500_v18, 0  ;;  %v627_v38 = vsel %vm382_vm5, %v2500_v18, 0 }
 0x2a8   : > { %v663_v33 = vrot.slane %v624_v32, 4  ;;  %v685_v40 = vrot.slane %v627_v38, 4  ;;  %vm2700_vm8 = vcmp.ne.s16.totalorder %v2344_v30, 0  ;;  %v907_v32 = vld [vmem:[#allocation2 + $0x2c0] sm:$0xff]  ;;  %vm2705_vm0 = vcmask 1039360  }
 0x2a9   : > { %v610_v20 = vpop.permute.xlu1 %609  ;;  %vm2708_vm5 = vcmp.ne.s16.totalorder %v2304_v13, 0 }
 0x2aa   : > { %v617_v22 = vsel %vm309_vm6, %v610_v20, 0  ;;  %v2512_v25 = vsel %vm309_vm6, %v608_v17, %v610_v20  ;;  %vm2699_vm6 = vcmp.ne.s16.totalorder %v2395_v42, 0  ;;  %v887_v17 = vld [vmem:[#allocation2 + $0x220] sm:$0xff]  ;;  %v1916_v20 = vcombine.low %v875_v10, %v879_v11 }
 0x2ab   : > { %652 = vrot.lane.b32.xlu1 %v621_v21, %s2174_s10  ;;  %678 = vrot.lane.b32.xlu0 %v617_v22, %s2171_s26  ;;  %v623_v28 = vsel %vm360_vm9, %v617_v22, 0  ;;  %v622_v26 = vsel %vm359_vm13, %v2512_v25, 0  ;;  %v632_v29 = vsel %vm396_vm14, %v617_v22, 0  ;;  %v631_v34 = vsel %vm395_vm2, %v2512_v25, 0  ;;  %v891_v21 = vld [vmem:[#allocation2 + $0x240] sm:$0xff] }
 0x2ac   : > { %v639_v27 = vrot.slane %v2512_v25, 4  ;;  %v640_v35 = vrot.slane %v617_v22, 4  ;;  %v625_v39 = vsel %vm371_vm1, %v2512_v25, 0  ;;  %v626_v41 = vsel %vm372_vm12, %v617_v22, 0  ;;  %vm2706_vm1 = vmmov %vm2705_vm0 }
 0x2ad   : > { %v664_v19 = vrot.slane %v625_v39, 4  ;;  %v628_v43 = vsel %vm2699_vm6, %v2512_v25, 0  ;;  %v665_v31 = vrot.slane %v626_v41, 4  ;;  %v629_v44 = vsel %vm2700_vm8, %v617_v22, 0 }
 0x2ae   : > { %v686_v37 = vrot.slane %v628_v43, 4  ;;  %v687_v45 = vrot.slane %v629_v44, 4  ;;  %vm2701_vm9 = vcmp.ne.s16.totalorder %v2366_v36, 0  ;;  %vm2702_vm12 = vcmp.ne.s16.totalorder %v2425_v54, 0  ;;  %v759_v54 = vld [vmem:[%s2674_s4] sm:$0xff] }
 0x2af   : > { %641 = vrot.lane.b32.xlu0 %v638_v24, %s2172_s28  ;;  %676 = vrot.lane.b32.xlu1 %v2512_v25, %s2171_s26  ;;  %v630_v23 = vsel %vm2701_vm9, %v2500_v18, 0  ;;  %v633_v42 = vsel %vm2702_vm12, %v2500_v18, 0  ;;  %vm2703_vm13 = vcmp.ne.s16.totalorder %v2427_v56, 0  ;;  %vm2704_vm14 = vcmp.ne.s16.totalorder %v2437_v58, 0 }
 0x2b0   : > { %v635_v30 = vsel %vm2703_vm13, %v617_v22, 0  ;;  %v634_v36 = vsel %vm2704_vm14, %v2512_v25, 0  ;;  %v1861_v56 = vcombine.high %v819_v46, %v823_v47  ;;  %v1868_v58 = vcombine.low %v827_v49, %v831_v50 }
 0x2b1   : > { %v1925_v22 = vcombine.high %v883_v16, %v887_v17  ;;  %vm2707_vm2 = vcmp.ne.s16.totalorder %v2307_v15, 0  ;;  %vm2709_vm6 = vcmask 916480   ;;  %vm2710_vm8 = vcmask 1031168  }
 0x2b2   : > { %1587 = vmatprep.subr.bf16.mxu0 %v1861_v56  ;;  %vm2711_vm9 = vmmov %vm2709_vm6  ;;  %vm2713_vm13 = vcmask 777216  }
 0x2b3   : > { %656 = vrot.lane.b32.xlu0 %v623_v28, %s2174_s10  ;;  %654 = vrot.lane.b32.xlu1 %v622_v26, %s2174_s10  ;;  %v1924_v28 = vcombine.low %v883_v16, %v887_v17  ;;  %vm2712_vm12 = vmmov %vm2710_vm8 }
 0x2b4   : > { %1588 = vmatpush1.bf16.msra.mxu0 %v1860_v48 }
 0x2b5   : > { %1589 = vmatprep.subr.bf16.mxu0 %v1869_v51 }
 0x2b7   : > { %703 = vrot.lane.b32.xlu0 %v632_v29, %s2175_s12  ;;  %701 = vrot.lane.b32.xlu1 %v631_v34, %s2175_s12  ;;  %v899_v29 = vld [vmem:[#allocation2 + $0x280] sm:$0xff] }
 0x2b8   : > { %1590 = vmatpush1.bf16.msra.mxu0 %v1868_v58  ;;  %v903_v34 = vld [vmem:[#allocation2 + $0x2a0] sm:$0xff]  ;;  %v620_v58 = vsel %vm2707_vm2, %v2512_v25, 0 }
 0x2b9   : > { %1591 = vmatprep.subr.bf16.mxu0 %v1877_v55  ;;  %v1940_v38 = vcombine.low %v899_v29, %v903_v34  ;;  %v619_v55 = vsel %vm2708_vm5, %v2500_v18, 0 }
 0x2bb   : > { %643 = vrot.lane.b32.xlu0 %v639_v27, %s2172_s28  ;;  %645 = vrot.lane.b32.xlu1 %v640_v35, %s2172_s28  ;;  %s257_s28 = sand.u32 1, %s2151_s22  }
 0x2bc   : > { %1592 = vmatpush1.bf16.msra.mxu0 %v1876_v60 }
 0x2bd   : > { %1593 = vmatprep.subr.bf16.mxu0 %v1885_v61 }
 0x2bf   : > { %666 = vrot.lane.b32.xlu0 %v663_v33, %s2176_s11  ;;  %709 = vrot.lane.b32.xlu1 %v639_v27, %s2173_s29  ;;  %v911_v33 = vld [vmem:[#allocation2 + $0x2e0] sm:$0xff] }
 0x2c0   : > { %1594 = vmatpush1.bf16.msra.mxu0 %v1884_v0  ;;  %v1949_v39 = vcombine.high %v907_v32, %v911_v33  ;;  %v1948_v41 = vcombine.low %v907_v32, %v911_v33 }
 0x2c1   : > { %1595 = vmatprep.subr.bf16.mxu0 %v1893_v1 }
 0x2c3   : > { %688 = vrot.lane.b32.xlu0 %v685_v40, %s2177_s9  ;;  %668 = vrot.lane.b32.xlu1 %v664_v19, %s2176_s11  ;;  %v915_v40 = vld [vmem:[#allocation2 + $0x300] sm:$0xff] }
 0x2c4   : > { %1596 = vmatpush1.bf16.msra.mxu0 %v1892_v4  ;;  %v919_v19 = vld [vmem:[#allocation2 + $0x320] sm:$0xff] }
 0x2c5   : > { %1597 = vmatprep.subr.bf16.mxu0 %v1901_v5  ;;  %v1957_v43 = vcombine.high %v915_v40, %v919_v19  ;;  %v1956_v44 = vcombine.low %v915_v40, %v919_v19  ;;  %v758_v19 = vld [vmem:[%s2673_s3] sm:$0xf] }
 0x2c7   : > { %670 = vrot.lane.b32.xlu0 %v665_v31, %s2176_s11  ;;  %690 = vrot.lane.b32.xlu1 %v686_v37, %s2177_s9  ;;  %v923_v31 = vld [vmem:[#allocation2 + $0x340] sm:$0xff] }
 0x2c8   : > { %1598 = vmatpush1.bf16.msra.mxu0 %v1900_v8  ;;  %v927_v37 = vld [vmem:[#allocation2 + $0x360] sm:$0xff] }
 0x2c9   : > { %1599 = vmatprep.subr.bf16.mxu0 %v1909_v9 }
 0x2cb   : > { %692 = vrot.lane.b32.xlu0 %v687_v45, %s2177_s9  ;;  %699 = vrot.lane.b32.xlu1 %v630_v23, %s2175_s12  ;;  %v1965_v45 = vcombine.high %v923_v31, %v927_v37  ;;  %v1964_v23 = vcombine.low %v923_v31, %v927_v37  ;;  %v836_v31 = vld [vmem:[#allocation2 + $0x88] sm:$0xff]  ;;  %s1994_s12 = sshll.u32 %s2236_s25, 10  ;;  %s1760_s25 = scalar_lea.sflag [#allocation4], %s257_s28 }
 0x2cc   : > { %1600 = vmatpush1.bf16.msra.mxu0 %v1908_v12  ;;  %v840_v37 = vld [vmem:[#allocation2 + $0xa8] sm:$0xff]  ;;  %s2626_s14 = scalar_lea.hbm %s2676_s6, %s1994_s12 }
 0x2cd   : > { %1601 = vmatprep.subr.bf16.mxu0 %v1917_v14 }
 0x2cf   : > { %711 = vrot.lane.b32.xlu0 %v640_v35, %s2173_s29  ;;  %718 = vrot.lane.b32.xlu1 %v633_v42, %s2178_s13  ;;  %v1941_v35 = vcombine.high %v899_v29, %v903_v34 }
 0x2d0   : > { %1602 = vmatpush1.bf16.msra.mxu0 %v1916_v20 }
 0x2d1   : > { %1603 = vmatprep.subr.bf16.mxu0 %v1925_v22 }
 0x2d3   : > { %707 = vrot.lane.b32.xlu0 %v638_v24, %s2173_s29  ;;  %722 = vrot.lane.b32.xlu1 %v635_v30, %s2178_s13  ;;  %v895_v24 = vld [vmem:[#allocation2 + $0x260] sm:$0xff]  ;;  %s1851_s29 = sshll.u32 %s257_s28, 6 }
 0x2d4   : > { %v1933_v26 = vcombine.high %v891_v21, %v895_v24  ;;  %1604 = vmatpush1.bf16.msra.mxu0 %v1924_v28  ;;  %v1932_v27 = vcombine.low %v891_v21, %v895_v24  ;;  %v820_v28 = vld [vmem:[#allocation2 + $0x8] sm:$0xff]  ;;  %s259_s10 = scalar_lea.vmem [#allocation5], %s1851_s29 }
 0x2d5   : > { %s1774_s11 = sshll.u32 %s259_s10, 4  ;;  %s2628_s11 = int_to_ptr.vmem [resolvable:$true] %s1774_s11 }
 0x2d6   : > { %1605 = vmatprep.subr.bf16.mxu0 %v1933_v26  ;;  %v824_v26 = vld [vmem:[#allocation2 + $0x28] sm:$0xff]  ;;  %s2093_s16 = scalar_lea.vmem %s2628_s11, 1024  ;;  %p2100_p2 = scmp.lt.s32.totalorder %s2628_s11, %s2098_s18 }
 0x2d7   : > { %720 = vrot.lane.b32.xlu0 %v634_v36, %s2178_s13  ;;  %p2094_p6 = scmp.ne.s32.totalorder %s2628_s11, %s2093_s16  ;;  %p2101_p3 = scmp.lt.s32.totalorder %s2099_s15, %s2093_s16 }
 0x2d8   : > { %1606 = vmatpush1.bf16.msra.mxu0 %v1932_v27 }
 0x2d9   : > { %1607 = vmatprep.subr.bf16.mxu0 %v1941_v35  ;;  %v1863_v35 = vcombine.high %v820_v28, %v824_v26  ;;  %p2095_p10 = pnand %p2094_p6, %p2715_p9  ;;  %p2102_p4 = por %p2101_p3, %p2100_p2 }
 0x2db   : > { %762 = vperm.xlu0 %2062, %v759_v54   ;;  %p2096_p12 = pneg %p2095_p10 }
 0x2dc   : > { %1608 = vmatpush1.bf16.msra.mxu0 %v1940_v38  ;;  %v828_v38 = vld [vmem:[#allocation2 + $0x48] sm:$0xff] }
 0x2dd   : > { %1609 = vmatprep.subr.bf16.mxu0 %v1949_v39  ;;  %v832_v39 = vld [vmem:[#allocation2 + $0x68] sm:$0xff]  ;;  %p2103_p7 = pnand %p2102_p4, %p2096_p12 }
 0x2e0   : > { %1610 = vmatpush1.bf16.msra.mxu0 %v1948_v41  ;;  %v1862_v41 = vcombine.low %v820_v28, %v824_v26  ;;  %v935_v28 = vld [vmem:[#allocation2 + $0x3a0] sm:$0xff]  ;;  %v932_v26 = vld [vmem:[#allocation2 + $0x388] sm:$0xff] }
 0x2e1   : > { %1611 = vmatprep.subr.bf16.mxu0 %v1957_v43  ;;  %v1871_v43 = vcombine.high %v828_v38, %v832_v39 }
 0x2e4   : > { %1612 = vmatpush1.bf16.msra.mxu0 %v1956_v44  ;;  %v1870_v44 = vcombine.low %v828_v38, %v832_v39  ;;  %v943_v38 = vld [vmem:[#allocation2 + $0x3e0] sm:$0xff]  ;;  %v940_v39 = vld [vmem:[#allocation2 + $0x3c8] sm:$0xff] }
 0x2e5   : > { %1613 = vmatprep.subr.bf16.mxu0 %v1965_v45  ;;  %v1879_v45 = vcombine.high %v836_v31, %v840_v37 }
 0x2e8   : > { %1614 = vmatpush1.bf16.msra.mxu0 %v1964_v23  ;;  %v844_v23 = vld [vmem:[#allocation2 + $0xc8] sm:$0xff] }
 0x319   : > { %v675_v42 = vpop.permute.xlu1 %674 }
 0x31d   : > { %v679_v30 = vpop.permute.xlu0 %678  ;;  %v653_v36 = vpop.permute.xlu1 %652 }
 0x321   : > { %v642_v54 = vpop.permute.xlu0 %641  ;;  %v677_v46 = vpop.permute.xlu1 %676 }
 0x322   : > { %v681_v7 = vsel %vm459_vm11, %v677_v46, %v679_v30  ;;  %v680_v9 = vsel %vm459_vm11, %v675_v42, %v677_v46  ;;  %v848_v42 = vld [vmem:[#allocation2 + $0xe8] sm:$0xff]  ;;  %v1878_v30 = vcombine.low %v836_v31, %v840_v37  ;;  %v821_v37 = vld [vmem:[#allocation2 + $0x10] sm:$0xff] }
 0x323   : > { %v856_v46 = vld [vmem:[#allocation2 + $0x128] sm:$0xff] }
 0x325   : > { %v657_v47 = vpop.permute.xlu0 %656  ;;  %v655_v48 = vpop.permute.xlu1 %654 }
 0x326   : > { %v659_v15 = vsel %vm2710_vm8, %v655_v48, %v657_v47  ;;  %v658_v13 = vsel %vm2712_vm12, %v653_v36, %v655_v48  ;;  %v1887_v36 = vcombine.high %v844_v23, %v848_v42  ;;  %v1886_v47 = vcombine.low %v844_v23, %v848_v42 }
 0x329   : > { %v704_v56 = vpop.permute.xlu0 %703  ;;  %v702_v49 = vpop.permute.xlu1 %701 }
 0x32a   : > { %v706_v14 = vsel %vm486_vm3, %v702_v49, %v704_v56  ;;  %v860_v56 = vld [vmem:[#allocation2 + $0x148] sm:$0xff] }
 0x32d   : > { %v644_v50 = vpop.permute.xlu0 %643  ;;  %v646_v51 = vpop.permute.xlu1 %645 }
 0x32e   : > { %v647_v52 = vsel %vm2705_vm0, %v642_v54, %v644_v50  ;;  %v648_v53 = vsel %vm2706_vm1, %v644_v50, %v646_v51  ;;  %v852_v54 = vld [vmem:[#allocation2 + $0x108] sm:$0xff] }
 0x32f   : > { %v732_v57 = vsel %vm510_vm7, %v620_v58, %v648_v53  ;;  %v728_v59 = vsel %vm510_vm7, %v619_v55, %v647_v52  ;;  %v1895_v48 = vcombine.high %v852_v54, %v856_v46  ;;  %v1894_v50 = vcombine.low %v852_v54, %v856_v46  ;;  %v868_v52 = vld [vmem:[#allocation2 + $0x188] sm:$0xff] }
 0x330   : > { %774 = vmatprep.subr.bf16.mxu1 %v732_v57  ;;  %v872_v53 = vld [vmem:[#allocation2 + $0x1a8] sm:$0xff] }
 0x331   : > { %v667_v60 = vpop.permute.xlu0 %666  ;;  %775 = vmatpush1.bf16.msra.mxu1 %v728_v59  ;;  %v710_v61 = vpop.permute.xlu1 %709  ;;  %v1911_v55 = vcombine.high %v868_v52, %v872_v53  ;;  %v876_v57 = vld [vmem:[#allocation2 + $0x1c8] sm:$0xff] }
 0x332   : > { %v880_v59 = vld [vmem:[#allocation2 + $0x1e8] sm:$0xff] }
 0x335   : > { %v689_v62 = vpop.permute.xlu0 %688  ;;  %v669_v63 = vpop.permute.xlu1 %668 }
 0x336   : > { %v672_v0 = vsel %vm2709_vm6, %v667_v60, %v669_v63  ;;  %v1910_v60 = vcombine.low %v868_v52, %v872_v53 }
 0x337   : > { %v736_v3 = vsel %vm510_vm7, %v658_v13, %v672_v0  ;;  %v1918_v0 = vcombine.low %v876_v57, %v880_v59 }
 0x339   : > { %v671_v1 = vpop.permute.xlu0 %670  ;;  %v691_v2 = vpop.permute.xlu1 %690 }
 0x33a   : > { %v673_v25 = vsel %vm2711_vm9, %v669_v63, %v671_v1  ;;  %v694_v4 = vsel %vm474_vm15, %v689_v62, %v691_v2  ;;  %v884_v62 = vld [vmem:[#allocation2 + $0x208] sm:$0xff] }
 0x33b   : > { %v740_v18 = vsel %vm510_vm7, %v659_v15, %v673_v25  ;;  %v744_v11 = vsel %vm510_vm7, %v680_v9, %v694_v4  ;;  %v888_v63 = vld [vmem:[#allocation2 + $0x228] sm:$0xff] }
 0x33c   : > { %776 = vmatprep.subr.bf16.mxu1 %v740_v18  ;;  %v1927_v1 = vcombine.high %v884_v62, %v888_v63  ;;  %v896_v15 = vld [vmem:[#allocation2 + $0x268] sm:$0xff]  ;;  %v1926_v25 = vcombine.low %v884_v62, %v888_v63  ;;  %v837_v62 = vld [vmem:[#allocation2 + $0x90] sm:$0xff] }
 0x33d   : > { %v693_v5 = vpop.permute.xlu0 %692  ;;  %777 = vmatpush1.bf16.msra.mxu1 %v736_v3  ;;  %v700_v6 = vpop.permute.xlu1 %699  ;;  %v900_v18 = vld [vmem:[#allocation2 + $0x288] sm:$0xff] }
 0x33e   : > { %v695_v8 = vsel %vm474_vm15, %v691_v2, %v693_v5  ;;  %v705_v21 = vsel %vm486_vm3, %v700_v6, %v702_v49  ;;  %vm2714_vm15 = vmmov %vm2713_vm13  ;;  %v864_v49 = vld [vmem:[#allocation2 + $0x168] sm:$0xff] }
 0x33f   : > { %v748_v10 = vsel %vm510_vm7, %v681_v7, %v695_v8  ;;  %v1903_v51 = vcombine.high %v860_v56, %v864_v49  ;;  %v1902_v58 = vcombine.low %v860_v56, %v864_v49  ;;  %v892_v2 = vld [vmem:[#allocation2 + $0x248] sm:$0xff] }
 0x340   : > { %778 = vmatprep.subr.bf16.mxu1 %v748_v10  ;;  %v1935_v13 = vcombine.high %v892_v2, %v896_v15  ;;  %v904_v3 = vld [vmem:[#allocation2 + $0x2a8] sm:$0xff]  ;;  %v1934_v4 = vcombine.low %v892_v2, %v896_v15  ;;  %v838_v2 = vld [vmem:[#allocation2 + $0x98] sm:$0xff] }
 0x341   : > { %v712_v12 = vpop.permute.xlu0 %711  ;;  %779 = vmatpush1.bf16.msra.mxu1 %v744_v11  ;;  %v719_v17 = vpop.permute.xlu1 %718  ;;  %v1943_v5 = vcombine.high %v900_v18, %v904_v3  ;;  %v908_v6 = vld [vmem:[#allocation2 + $0x2c8] sm:$0xff]  ;;  %v1942_v8 = vcombine.low %v900_v18, %v904_v3  ;;  %v842_v15 = vld [vmem:[#allocation2 + $0xb8] sm:$0xff] }
 0x342   : > { %v714_v16 = vsel %vm2713_vm13, %v710_v61, %v712_v12  ;;  %v912_v7 = vld [vmem:[#allocation2 + $0x2e8] sm:$0xff]  ;;  %v1883_v3 = vcombine.high %v838_v2, %v842_v15 }
 0x343   : > { %v756_v20 = vsel %vm510_vm7, %v706_v14, %v714_v16  ;;  %v1951_v9 = vcombine.high %v908_v6, %v912_v7  ;;  %v916_v10 = vld [vmem:[#allocation2 + $0x308] sm:$0xff]  ;;  %v1950_v12 = vcombine.low %v908_v6, %v912_v7  ;;  %v846_v6 = vld [vmem:[#allocation2 + $0xd8] sm:$0xff] }
 0x344   : > { %780 = vmatprep.subr.bf16.mxu1 %v756_v20  ;;  %v920_v11 = vld [vmem:[#allocation2 + $0x328] sm:$0xff]  ;;  %v850_v7 = vld [vmem:[#allocation2 + $0xf8] sm:$0xff] }
 0x345   : > { %v708_v22 = vpop.permute.xlu0 %707  ;;  %v723_v34 = vpop.permute.xlu1 %722  ;;  %v1959_v14 = vcombine.high %v916_v10, %v920_v11  ;;  %v924_v16 = vld [vmem:[#allocation2 + $0x348] sm:$0xff]  ;;  %v1958_v20 = vcombine.low %v916_v10, %v920_v11  ;;  %v1891_v11 = vcombine.high %v846_v6, %v850_v7 }
 0x346   : > { %v713_v24 = vsel %vm2714_vm15, %v708_v22, %v710_v61  ;;  %v1919_v61 = vcombine.high %v876_v57, %v880_v59  ;;  %v830_v57 = vld [vmem:[#allocation2 + $0x58] sm:$0xff] }
 0x347   : > { %v752_v29 = vsel %vm510_vm7, %v705_v21, %v713_v24  ;;  %v931_v24 = vld [vmem:[#allocation2 + $0x380] sm:$0xff]  ;;  %v834_v59 = vld [vmem:[#allocation2 + $0x78] sm:$0xff] }
 0x348   : > { %781 = vmatpush1.bf16.msra.mxu1 %v752_v29  ;;  %v1973_v29 = vcombine.high %v931_v24, %v935_v28 }
 0x349   : > { %v721_v27 = vpop.permute.xlu0 %720 }
 0x34a   : > { %v724_v32 = vsel %vm507_vm4, %v719_v17, %v721_v27  ;;  %v725_v33 = vsel %vm507_vm4, %v721_v27, %v723_v34  ;;  %v928_v17 = vld [vmem:[#allocation2 + $0x368] sm:$0xff]  ;;  %v1972_v27 = vcombine.low %v931_v24, %v935_v28  ;;  %1615 = vmatprep.subr.bf16.mxu0 %v1973_v29  ;;  %v861_v28 = vld [vmem:[#allocation2 + $0x150] sm:$0xff]  ;;  %v862_v29 = vld [vmem:[#allocation2 + $0x158] sm:$0xff] }
 0x34b   : > { %1858 = vmatprep.subr.msk.bf16.mxu1 %vm510_vm7, %v725_v33  ;;  %v769_v40 = vsel %vm510_vm7, %v724_v32, 0  ;;  %v1967_v22 = vcombine.high %v924_v16, %v928_v17  ;;  %v1966_v21 = vcombine.low %v924_v16, %v928_v17  ;;  %v936_v34 = vld [vmem:[#allocation2 + $0x3a8] sm:$0xff]  ;;  %v939_v33 = vld [vmem:[#allocation2 + $0x3c0] sm:$0xff]  ;;  %v854_v16 = vld [vmem:[#allocation2 + $0x118] sm:$0xff] }
 0x34c   : > { %783 = vmatpush1.bf16.msra.mxu1 %v769_v40  ;;  %v1975_v32 = vcombine.high %v932_v26, %v936_v34  ;;  %1616 = vmatpush1.bf16.msra.mxu0 %v1972_v27  ;;  %v1980_v40 = vcombine.low %v939_v33, %v943_v38  ;;  %v858_v17 = vld [vmem:[#allocation2 + $0x138] sm:$0xff] }
 0x34d   : > { %1628 = vmatprep.subr.bf16.mxu1 %v1863_v35  ;;  %v1974_v35 = vcombine.low %v932_v26, %v936_v34  ;;  %v1899_v24 = vcombine.high %v854_v16, %v858_v17  ;;  %v865_v26 = vld [vmem:[#allocation2 + $0x170] sm:$0xff]  ;;  %v866_v34 = vld [vmem:[#allocation2 + $0x178] sm:$0xff] }
 0x34f   : > { %1859 = vmatmul.mubr.msk.bf16.vlgmr.msra.gmra.mrb[0].mxu1 %vm550_vm10, %v758_v19  ;;  %v1981_v19 = vcombine.high %v939_v33, %v943_v38  ;;  %v1907_v33 = vcombine.high %v862_v29, %v866_v34  ;;  %v869_v38 = vld [vmem:[#allocation2 + $0x190] sm:$0xff] }
 0x350   : > { %1629 = vmatpush1.bf16.msra.mxu1 %v1862_v41  ;;  %v944_v41 = vld [vmem:[#allocation2 + $0x3e8] sm:$0xff] }
 0x351   : > { %1630 = vmatprep.subr.bf16.mxu1 %v1871_v43  ;;  %v1982_v43 = vcombine.low %v940_v39, %v944_v41  ;;  %v1983_v31 = vcombine.high %v940_v39, %v944_v41  ;;  %1617 = vmatprep.subr.bf16.mxu0 %v1981_v19  ;;  %v873_v39 = vld [vmem:[#allocation2 + $0x1b0] sm:$0xff]  ;;  %v874_v19 = vld [vmem:[#allocation2 + $0x1b8] sm:$0xff]  ;;  %v1904_v41 = vcombine.low %v861_v28, %v865_v26 }
 0x352   : > { %1618 = vmatpush1.bf16.msra.mxu0 %v1980_v40  ;;  %v870_v40 = vld [vmem:[#allocation2 + $0x198] sm:$0xff] }
 0x354   : > { %1631 = vmatpush1.bf16.msra.mxu1 %v1870_v44  ;;  %v825_v44 = vld [vmem:[#allocation2 + $0x30] sm:$0xff] }
 0x355   : > { %1632 = vmatprep.subr.bf16.mxu1 %v1879_v45  ;;  %v822_v45 = vld [vmem:[#allocation2 + $0x18] sm:$0xff]  ;;  %v1864_v23 = vcombine.low %v821_v37, %v825_v44  ;;  %v1865_v42 = vcombine.high %v821_v37, %v825_v44  ;;  %v1915_v37 = vcombine.high %v870_v40, %v874_v19  ;;  %v877_v44 = vld [vmem:[#allocation2 + $0x1d0] sm:$0xff] }
 0x357   : > { %1669 = vmatprep.subr.bf16.mxu0 %v1865_v42  ;;  %v882_v42 = vld [vmem:[#allocation2 + $0x1f8] sm:$0xff] }
 0x358   : > { %1633 = vmatpush1.bf16.msra.mxu1 %v1878_v30  ;;  %v826_v30 = vld [vmem:[#allocation2 + $0x38] sm:$0xff] }
 0x359   : > { %1634 = vmatprep.subr.bf16.mxu1 %v1887_v36  ;;  %v1866_v36 = vcombine.low %v822_v45, %v826_v30  ;;  %v1867_v54 = vcombine.high %v822_v45, %v826_v30  ;;  %v881_v45 = vld [vmem:[#allocation2 + $0x1f0] sm:$0xff]  ;;  %v1912_v30 = vcombine.low %v869_v38, %v873_v39 }
 0x35a   : > { %v763_v46 = vpop.permute.xlu0 %762 }
 0x35c   : > { %1635 = vmatpush1.bf16.msra.mxu1 %v1886_v47 }
 0x35d   : > { %1636 = vmatprep.subr.bf16.mxu1 %v1895_v48 }
 0x360   : > { %1637 = vmatpush1.bf16.msra.mxu1 %v1894_v50 }
 0x361   : > { %1638 = vmatprep.subr.bf16.mxu1 %v1903_v51 }
 0x364   : > { %1639 = vmatpush1.bf16.msra.mxu1 %v1902_v58  ;;  %v829_v58 = vld [vmem:[#allocation2 + $0x50] sm:$0xff] }
 0x365   : > { %1640 = vmatprep.subr.bf16.mxu1 %v1911_v55  ;;  %v833_v55 = vld [vmem:[#allocation2 + $0x70] sm:$0xff] }
 0x366   : > { %v1873_v63 = vcombine.high %v829_v58, %v833_v55 }
 0x368   : > { %1641 = vmatpush1.bf16.msra.mxu1 %v1910_v60 }
 0x369   : > { %1642 = vmatprep.subr.bf16.mxu1 %v1919_v61 }
 0x36c   : > { %1643 = vmatpush1.bf16.msra.mxu1 %v1918_v0  ;;  %v1875_v0 = vcombine.high %v830_v57, %v834_v59 }
 0x36d   : > { %1644 = vmatprep.subr.bf16.mxu1 %v1927_v1  ;;  %v841_v1 = vld [vmem:[#allocation2 + $0xb0] sm:$0xff] }
 0x36e   : > { %v1881_v18 = vcombine.high %v837_v62, %v841_v1 }
 0x370   : > { %1645 = vmatpush1.bf16.msra.mxu1 %v1926_v25  ;;  %v1872_v25 = vcombine.low %v829_v58, %v833_v55  ;;  %v893_v58 = vld [vmem:[#allocation2 + $0x250] sm:$0xff] }
 0x371   : > { %1646 = vmatprep.subr.bf16.mxu1 %v1935_v13  ;;  %v1874_v13 = vcombine.low %v830_v57, %v834_v59  ;;  %v897_v55 = vld [vmem:[#allocation2 + $0x270] sm:$0xff]  ;;  %v894_v57 = vld [vmem:[#allocation2 + $0x258] sm:$0xff] }
 0x372   : > { %v898_v59 = vld [vmem:[#allocation2 + $0x278] sm:$0xff] }
 0x374   : > { %1647 = vmatpush1.bf16.msra.mxu1 %v1934_v4  ;;  %v845_v4 = vld [vmem:[#allocation2 + $0xd0] sm:$0xff] }
 0x375   : > { %1648 = vmatprep.subr.bf16.mxu1 %v1943_v5  ;;  %v849_v5 = vld [vmem:[#allocation2 + $0xf0] sm:$0xff] }
 0x376   : > { %v1889_v10 = vcombine.high %v845_v4, %v849_v5 }
 0x378   : > { %1649 = vmatpush1.bf16.msra.mxu1 %v1942_v8  ;;  %v1880_v8 = vcombine.low %v837_v62, %v841_v1  ;;  %v901_v1 = vld [vmem:[#allocation2 + $0x290] sm:$0xff] }
 0x379   : > { %1650 = vmatprep.subr.bf16.mxu1 %v1951_v9  ;;  %v1882_v9 = vcombine.low %v838_v2, %v842_v15  ;;  %v905_v2 = vld [vmem:[#allocation2 + $0x2b0] sm:$0xff]  ;;  %v902_v15 = vld [vmem:[#allocation2 + $0x298] sm:$0xff] }
 0x37c   : > { %1651 = vmatpush1.bf16.msra.mxu1 %v1950_v12  ;;  %v853_v12 = vld [vmem:[#allocation2 + $0x110] sm:$0xff] }
 0x37d   : > { %1652 = vmatprep.subr.bf16.mxu1 %v1959_v14  ;;  %v857_v14 = vld [vmem:[#allocation2 + $0x130] sm:$0xff] }
 0x37e   : > { %v1896_v27 = vcombine.low %v853_v12, %v857_v14 }
 0x380   : > { %1653 = vmatpush1.bf16.msra.mxu1 %v1958_v20  ;;  %v1888_v20 = vcombine.low %v845_v4, %v849_v5  ;;  %v909_v5 = vld [vmem:[#allocation2 + $0x2d0] sm:$0xff] }
 0x381   : > { %1654 = vmatprep.subr.bf16.mxu1 %v1967_v22  ;;  %v1890_v22 = vcombine.low %v846_v6, %v850_v7  ;;  %v913_v6 = vld [vmem:[#allocation2 + $0x2f0] sm:$0xff]  ;;  %v910_v7 = vld [vmem:[#allocation2 + $0x2d8] sm:$0xff] }
 0x384   : > { %1655 = vmatpush1.bf16.msra.mxu1 %v1966_v21  ;;  %v1897_v21 = vcombine.high %v853_v12, %v857_v14  ;;  %v917_v14 = vld [vmem:[#allocation2 + $0x310] sm:$0xff] }
 0x385   : > { %1656 = vmatprep.subr.bf16.mxu1 %v1975_v32  ;;  %v1905_v32 = vcombine.high %v861_v28, %v865_v26  ;;  %v925_v26 = vld [vmem:[#allocation2 + $0x350] sm:$0xff] }
 0x388   : > { %1657 = vmatpush1.bf16.msra.mxu1 %v1974_v35  ;;  %v1898_v35 = vcombine.low %v854_v16, %v858_v17  ;;  %v921_v16 = vld [vmem:[#allocation2 + $0x330] sm:$0xff]  ;;  %v918_v17 = vld [vmem:[#allocation2 + $0x318] sm:$0xff] }
 0x389   : > { %1658 = vmatprep.subr.bf16.mxu1 %v1983_v31  ;;  %v1913_v31 = vcombine.high %v869_v38, %v873_v39  ;;  %v933_v39 = vld [vmem:[#allocation2 + $0x390] sm:$0xff] }
 0x38c   : > { %1659 = vmatpush1.bf16.msra.mxu1 %v1982_v43  ;;  %v1906_v43 = vcombine.low %v862_v29, %v866_v34  ;;  %v929_v29 = vld [vmem:[#allocation2 + $0x370] sm:$0xff]  ;;  %v926_v34 = vld [vmem:[#allocation2 + $0x358] sm:$0xff] }
 0x38d   : > { %1710 = vmatprep.subr.bf16.mxu1 %v1867_v54  ;;  %v1921_v54 = vcombine.high %v877_v44, %v881_v45 }
 0x422   : > { %v808_v47 = vpop.f32.mrb[0].mxu1 }
 0x423   : > { %v809_v48 = vadd.f32 %v808_v47, %v763_v46  ;;  %v810_v56 = vpop.f32.mrb[1].mxu1  ;;  %v885_v47 = vld [vmem:[#allocation2 + $0x210] sm:$0xff] }
 0x424   : > { %v811_v49 = vadd.f32 %v810_v56, %v763_v46  ;;  %v812_v50 = vpop.f32.mrb[2].mxu1  ;;  %v886_v56 = vld [vmem:[#allocation2 + $0x218] sm:$0xff] }
 0x425   : > { %v815_v51 = vmax.f32 %v809_v48, 0.0  ;;  %v813_v52 = vpop.f32.mrb[3].mxu1  ;;  %v889_v48 = vld [vmem:[#allocation2 + $0x230] sm:$0xff]  ;;  %v1920_v50 = vcombine.low %v877_v44, %v881_v45 }
 0x426   : > { %v816_v53 = vmax.f32 %v811_v49, 0.0  ;;  %v890_v49 = vld [vmem:[#allocation2 + $0x238] sm:$0xff]  ;;  %v1929_v52 = vcombine.high %v885_v47, %v889_v48  ;;  %v941_v45 = vld [vmem:[#allocation2 + $0x3d0] sm:$0xff] }
 0x427   : > { %v2613_v61 = vpack.c.bf16 %v815_v51, %v815_v51  ;;  %v1930_v62 = vcombine.low %v886_v56, %v890_v49 }
 0x428   : > { %v818_v60 = vpack.c.bf16 %v816_v53, %v816_v53  ;;  %v1931_v53 = vcombine.high %v886_v56, %v890_v49 }
 0x42a   : > { %1619 = vmatprep.mubr.bf16.mxu0 %v818_v60  ;;  %1660 = vmatprep.mubr.bf16.mxu1 %v818_v60 }
 0x42b   : > { %1620 = vmatmul.mubr.bf16.vlgmr.msra.gmra.mrb[4].mxu0 %v2613_v61  ;;  %1661 = vmatmul.mubr.bf16.vlgmr.msra.gmra.mrb[4].mxu1 %v2613_v61 }
 0x42c   : > { %1670 = vmatpush1.bf16.msra.mxu0 %v1864_v23  ;;  %1711 = vmatpush1.bf16.msra.mxu1 %v1866_v36  ;;  %v878_v23 = vld [vmem:[#allocation2 + $0x1d8] sm:$0xff]  ;;  %v1914_v36 = vcombine.low %v870_v40, %v874_v19  ;;  %v937_v40 = vld [vmem:[#allocation2 + $0x3b0] sm:$0xff] }
 0x42d   : > { %1701 = vmatprep.mubr.bf16.mxu0 %v818_v60  ;;  %1742 = vmatprep.mubr.bf16.mxu1 %v818_v60  ;;  %v1923_v46 = vcombine.high %v878_v23, %v882_v42  ;;  %v1922_v51 = vcombine.low %v878_v23, %v882_v42  ;;  %v1928_v60 = vcombine.low %v885_v47, %v889_v48  ;;  %v934_v19 = vld [vmem:[#allocation2 + $0x398] sm:$0xff]  ;;  %v945_v23 = vld [vmem:[#allocation2 + $0x3f0] sm:$0xff] }
 0x42e   : > { %1671 = vmatprep.subr.bf16.mxu0 %v1873_v63  ;;  %1712 = vmatprep.subr.bf16.mxu1 %v1875_v0  ;;  %v1937_v63 = vcombine.high %v893_v58, %v897_v55  ;;  %v1939_v0 = vcombine.high %v894_v57, %v898_v59  ;;  %v942_v42 = vld [vmem:[#allocation2 + $0x3d8] sm:$0xff]  ;;  %v1984_v48 = vcombine.low %v941_v45, %v945_v23 }
 0x430   : > { %1672 = vmatpush1.bf16.msra.mxu0 %v1872_v25  ;;  %1713 = vmatpush1.bf16.msra.mxu1 %v1874_v13  ;;  %v906_v25 = vld [vmem:[#allocation2 + $0x2b8] sm:$0xff]  ;;  %v1936_v13 = vcombine.low %v893_v58, %v897_v55 }
 0x431   : > { %1673 = vmatprep.subr.bf16.mxu0 %v1881_v18  ;;  %1714 = vmatprep.subr.bf16.mxu1 %v1883_v3  ;;  %v1938_v18 = vcombine.low %v894_v57, %v898_v59  ;;  %v1945_v3 = vcombine.high %v901_v1, %v905_v2  ;;  %v1947_v4 = vcombine.high %v902_v15, %v906_v25 }
 0x434   : > { %1674 = vmatpush1.bf16.msra.mxu0 %v1880_v8  ;;  %1715 = vmatpush1.bf16.msra.mxu1 %v1882_v9  ;;  %v914_v8 = vld [vmem:[#allocation2 + $0x2f8] sm:$0xff]  ;;  %v1944_v9 = vcombine.low %v901_v1, %v905_v2 }
 0x435   : > { %1675 = vmatprep.subr.bf16.mxu0 %v1889_v10  ;;  %1716 = vmatprep.subr.bf16.mxu1 %v1891_v11  ;;  %v1946_v10 = vcombine.low %v902_v15, %v906_v25  ;;  %v1953_v11 = vcombine.high %v909_v5, %v913_v6  ;;  %v1955_v12 = vcombine.high %v910_v7, %v914_v8 }
 0x438   : > { %1676 = vmatpush1.bf16.msra.mxu0 %v1888_v20  ;;  %1717 = vmatpush1.bf16.msra.mxu1 %v1890_v22  ;;  %v922_v20 = vld [vmem:[#allocation2 + $0x338] sm:$0xff]  ;;  %v1952_v22 = vcombine.low %v909_v5, %v913_v6 }
 0x439   : > { %1677 = vmatprep.subr.bf16.mxu0 %v1897_v21  ;;  %1718 = vmatprep.subr.bf16.mxu1 %v1899_v24  ;;  %v1954_v21 = vcombine.low %v910_v7, %v914_v8  ;;  %v1961_v24 = vcombine.high %v917_v14, %v921_v16  ;;  %v1963_v28 = vcombine.high %v918_v17, %v922_v20 }
 0x43c   : > { %1678 = vmatpush1.bf16.msra.mxu0 %v1896_v27  ;;  %1719 = vmatpush1.bf16.msra.mxu1 %v1898_v35  ;;  %v930_v27 = vld [vmem:[#allocation2 + $0x378] sm:$0xff]  ;;  %v1960_v35 = vcombine.low %v917_v14, %v921_v16 }
 0x43d   : > { %1679 = vmatprep.subr.bf16.mxu0 %v1905_v32  ;;  %1720 = vmatprep.subr.bf16.mxu1 %v1907_v33  ;;  %v1962_v32 = vcombine.low %v918_v17, %v922_v20  ;;  %v1969_v33 = vcombine.high %v925_v26, %v929_v29  ;;  %v1971_v38 = vcombine.high %v926_v34, %v930_v27 }
 0x440   : > { %1680 = vmatpush1.bf16.msra.mxu0 %v1904_v41  ;;  %1721 = vmatpush1.bf16.msra.mxu1 %v1906_v43  ;;  %v938_v41 = vld [vmem:[#allocation2 + $0x3b8] sm:$0xff]  ;;  %v1968_v43 = vcombine.low %v925_v26, %v929_v29 }
 0x441   : > { %1681 = vmatprep.subr.bf16.mxu0 %v1913_v31  ;;  %1722 = vmatprep.subr.bf16.mxu1 %v1915_v37  ;;  %v1970_v31 = vcombine.low %v926_v34, %v930_v27  ;;  %v1977_v37 = vcombine.high %v933_v39, %v937_v40  ;;  %v1979_v44 = vcombine.high %v934_v19, %v938_v41 }
 0x444   : > { %1682 = vmatpush1.bf16.msra.mxu0 %v1912_v30  ;;  %1723 = vmatpush1.bf16.msra.mxu1 %v1914_v36  ;;  %v946_v30 = vld [vmem:[#allocation2 + $0x3f8] sm:$0xff]  ;;  %v1976_v36 = vcombine.low %v933_v39, %v937_v40 }
 0x445   : > { %1683 = vmatprep.subr.bf16.mxu0 %v1921_v54  ;;  %1724 = vmatprep.subr.bf16.mxu1 %v1923_v46  ;;  %v1978_v54 = vcombine.low %v934_v19, %v938_v41  ;;  %v1985_v46 = vcombine.high %v941_v45, %v945_v23  ;;  %v1987_v47 = vcombine.high %v942_v42, %v946_v30 }
 0x446   : > { %v1986_v56 = vcombine.low %v942_v42, %v946_v30 }
 0x448   : > { %1684 = vmatpush1.bf16.msra.mxu0 %v1920_v50  ;;  %1725 = vmatpush1.bf16.msra.mxu1 %v1922_v51 }
 0x449   : > { %1685 = vmatprep.subr.bf16.mxu0 %v1929_v52  ;;  %1726 = vmatprep.subr.bf16.mxu1 %v1931_v53 }
 0x44c   : > { %1686 = vmatpush1.bf16.msra.mxu0 %v1928_v60  ;;  %1727 = vmatpush1.bf16.msra.mxu1 %v1930_v62 }
 0x44d   : > { %1687 = vmatprep.subr.bf16.mxu0 %v1937_v63  ;;  %1728 = vmatprep.subr.bf16.mxu1 %v1939_v0 }
 0x450   : > { %1688 = vmatpush1.bf16.msra.mxu0 %v1936_v13  ;;  %1729 = vmatpush1.bf16.msra.mxu1 %v1938_v18 }
 0x451   : > { %1689 = vmatprep.subr.bf16.mxu0 %v1945_v3  ;;  %1730 = vmatprep.subr.bf16.mxu1 %v1947_v4 }
 0x454   : > { %1690 = vmatpush1.bf16.msra.mxu0 %v1944_v9  ;;  %1731 = vmatpush1.bf16.msra.mxu1 %v1946_v10 }
 0x455   : > { %1691 = vmatprep.subr.bf16.mxu0 %v1953_v11  ;;  %1732 = vmatprep.subr.bf16.mxu1 %v1955_v12 }
 0x458   : > { %1692 = vmatpush1.bf16.msra.mxu0 %v1952_v22  ;;  %1733 = vmatpush1.bf16.msra.mxu1 %v1954_v21 }
 0x459   : > { %1693 = vmatprep.subr.bf16.mxu0 %v1961_v24  ;;  %1734 = vmatprep.subr.bf16.mxu1 %v1963_v28 }
 0x45c   : > { %1694 = vmatpush1.bf16.msra.mxu0 %v1960_v35  ;;  %1735 = vmatpush1.bf16.msra.mxu1 %v1962_v32 }
 0x45d   : > { %1695 = vmatprep.subr.bf16.mxu0 %v1969_v33  ;;  %1736 = vmatprep.subr.bf16.mxu1 %v1971_v38 }
 0x460   : > { %1696 = vmatpush1.bf16.msra.mxu0 %v1968_v43  ;;  %1737 = vmatpush1.bf16.msra.mxu1 %v1970_v31 }
 0x461   : > { %1697 = vmatprep.subr.bf16.mxu0 %v1977_v37  ;;  %1738 = vmatprep.subr.bf16.mxu1 %v1979_v44 }
 0x464   : > { %1698 = vmatpush1.bf16.msra.mxu0 %v1976_v36  ;;  %1739 = vmatpush1.bf16.msra.mxu1 %v1978_v54 }
 0x465   : > { %1699 = vmatprep.subr.bf16.mxu0 %v1985_v46  ;;  %1740 = vmatprep.subr.bf16.mxu1 %v1987_v47 }
 0x468   : > { %1700 = vmatpush1.bf16.msra.mxu0 %v1984_v48  ;;  %1741 = vmatpush1.bf16.msra.mxu1 %v1986_v56 }
 0x46b   : > { %1702 = vmatmul.mubr.bf16.vlgmr.msra.gmra.mrb[8].mxu0 %v2613_v61  ;;  %1743 = vmatmul.mubr.bf16.vlgmr.msra.gmra.mrb[8].mxu1 %v2613_v61 }
 0x4fe   : > { %v1621_v49 = vpop.f32.mrb[4].mxu0  ;;  %v1662_v50 = vpop.f32.mrb[4].mxu1 }
 0x4ff   : > { %1751 = vst [vmem:[%s259_s10] sm:$0xff] %v1621_v49  ;;  %1753 = vst [vmem:[%s259_s10 + $0x10] sm:$0xff] %v1662_v50  ;;  %v1623_v51 = vpop.f32.mrb[5].mxu0  ;;  %v1664_v52 = vpop.f32.mrb[5].mxu1 }
 0x500   : > { %1752 = vst [vmem:[%s259_s10 + $0x8] sm:$0xff] %v1623_v51  ;;  %1754 = vst [vmem:[%s259_s10 + $0x18] sm:$0xff] %v1664_v52  ;;  %v1625_v53 = vpop.f32.mrb[6].mxu0  ;;  %v1666_v58 = vpop.f32.mrb[6].mxu1 }
 0x501   : > { %v1626_v55 = vpop.f32.mrb[7].mxu0  ;;  %v1667_v57 = vpop.f32.mrb[7].mxu1 }
 0x53e   : > { %v1703_v61 = vpop.f32.mrb[8].mxu0  ;;  %v1744_v59 = vpop.f32.mrb[8].mxu1 }
 0x53f   : > { %1755 = vst [vmem:[%s259_s10 + $0x20] sm:$0xff] %v1703_v61  ;;  %1757 = vst [vmem:[%s259_s10 + $0x30] sm:$0xff] %v1744_v59  ;;  %v1705_v60 = vpop.f32.mrb[9].mxu0  ;;  %v1746_v62 = vpop.f32.mrb[9].mxu1 }
 0x540   : > { %1756 = vst [vmem:[%s259_s10 + $0x28] sm:$0xff] %v1705_v60  ;;  %1758 = vst [vmem:[%s259_s10 + $0x38] sm:$0xff] %v1746_v62  ;;  %v1707_v63 = vpop.f32.mrb[10].mxu0  ;;  %v1748_v0 = vpop.f32.mrb[10].mxu1 }
 0x541   : > { %v1708_v1 = vpop.f32.mrb[11].mxu0  ;;  %v1749_v2 = vpop.f32.mrb[11].mxu1 }
 0x542   : > { %2106 = shalt.err (!%p2103_p7)
}
 0x543   : > { %s2107_s19 = scalar_lea.hbm %s2626_s14, 1024  ;;  %s2111_s28 = scalar_lea.hbm %s2676_s6, 2048 }
 0x544   : > { %p2108_p8 = scmp.ne.s32.totalorder %s2626_s14, %s2107_s19  ;;  %p2112_p1 = scmp.lt.u32.totalorder %s2626_s14, %s2676_s6 }
 0x545   : > { %p2113_p0 = scmp.lt.u32.totalorder %s2111_s28, %s2107_s19  ;;  %p2115_p6 = scmp.lt.u32.totalorder %s2107_s19, %s2626_s14 }
 0x546   : > { %p2109_p11 = pnand %p2108_p8, %p2715_p9 }
 0x547   : > { %p2114_p5 = por %p2113_p0, %p2112_p1 }
 0x548   : > { %p2110_p13 = pneg %p2109_p11 }
 0x549   : > { %p2116_p10 = por %p2115_p6, %p2114_p5 }
 0x54b   : > { %p2117_p12 = pnand %p2116_p10, %p2110_p13 }
 0x54d   : > { %2120 = shalt.err (!%p2117_p12)
}
 0x54e   : > { %1999 = dma.vmem_to_hbm [thread:$0]  (%p2715_p9), %s2628_s11, 1024, %s2626_s14, %s1760_s25  }
 0x54f PF: > { %p2011_p2 = scmp.ge.s32.totalorder %s2159_s24, 2  ;;  %s1786_s12 = sand.u32 1, %s2147_s21  }
 0x550   : > { %p2716_p3 = scmp.ne.s32.totalorder %s2693_s8, 0  ;;  %s1787_s9 = scalar_lea.sflag [#allocation4], %s1786_s12 }
 0x552   : > { %p2006_p4 = pnand %p2011_p2, %p2716_p3 }
 0x554   : > { %2142 = dma.done.wait (!%p2006_p4), %s1787_s9, 1024  }
 0x555   : > { %2144 = vsyncadd (!%p2006_p4), %s1787_s9, 4294966272  ;;  %p17_p7 = scmp.ge.s32.totalorder %s2240_s27, 4   ;;  %s2717_s21 = smov %s2151_s22 }
 0x556   : > { %s2718_s22 = smov %s2155_s23  ;;  %s2719_s23 = smov %s2251_s30 }
 0x557   : > { %s2720_s24 = smov %s2240_s27  ;;  %19 = sbr.rel (!%p17_p7) target bundleno = 4 (0x4), region = 84 }
 0x55e   :  { %1792 = vsyncpa [#allocation3], 1 }
 0x55f   :  { %1794 = vsyncpa [#allocation3 + $0x1], 1 }
 0x560   :  { %1795 = vsyncpa [#allocation4], 1 }
 0x561   :  { %1797 = vsyncpa [#allocation4 + $0x1], 1 }

</bundles_post_ra>
